<compile_context>
chip_gen: v6e
topology: v6e:2x2x1
jax: 0.10.0
libtpu: 0.0.40
codegen_flags: <defaults>
</compile_context>

<pallas_src>
import functools

import jax
import jax.numpy as jnp
from jax import lax
from jax.experimental import pallas as pl
from jax.experimental.pallas import tpu as pltpu


def _fused_mdgc_kernel(x_ref, y_ref, w_ref, shift_ref, xo_ref, yo_ref, sel_ref, *,
                       nx, ny, inner_k, cross_k, conv_times, gather_dtype):
    n = nx + ny
    k_total = inner_k + cross_k
    bb = x_ref.shape[0]
    f32 = jnp.float32
    big = 1e30                     # Python scalars only (no captured jax.Array constants)
    n_f = float(n)

    # Masks shared by every batch item in this block (built once, hoisted out of the b-loop).
    row_id = lax.broadcasted_iota(jnp.int32, (n, n), 0)
    col_id = lax.broadcasted_iota(jnp.int32, (n, n), 1)
    col_f = col_id.astype(f32)
    same_set = (row_id < nx) == (col_id < nx)
    diag = row_id == col_id

    # ---------------- per-item KNN -> one-hot selection rows written straight to VMEM ----------
    xy_slabs = []
    for b in range(bb):
        # NCHW-squeezed (C, Nx)/(C, Ny) -> point-major (N, C); transposes stay on-chip (XLU).
        x_nc = jnp.transpose(x_ref[b])                       # (Nx, C)
        y_nc = jnp.transpose(y_ref[b])                       # (Ny, C)
        xy_b = jnp.concatenate([x_nc, y_nc], axis=0)         # (N, C)
        xy_slabs.append(xy_b)

        # Ranking score score_ij = |p_j|^2 - 2 p_i.p_j (per-row |p_i|^2 can't change the
        # within-row order). -2 scale and row-norm add folded into ONE width-(C+1) MXU matmul.
        sq_j = jnp.sum(xy_b * xy_b, axis=1, keepdims=True)                         # (N, 1)
        lhs = jnp.concatenate([-2.0 * xy_b, jnp.ones((n, 1), f32)], axis=1)        # (N, C+1)
        rhs = jnp.concatenate([xy_b, sq_j], axis=1)                                # (N, C+1)
        score = lax.dot_general(lhs, rhs, dimension_numbers=(((1,), (1,)), ((), ())),
                                preferred_element_type=f32)                        # (N, N)

        def run_topk(s, k_count, k_base):
            # Iterative masked row-min top-k; each pass emits a one-hot row-slab directly
            # into the shared selection scratch (no concat, single live (N,N) mask).
            for k in range(k_count):
                mn = jnp.min(s, axis=-1, keepdims=True)                            # lane reduce
                hit = s <= mn
                idx = jnp.min(jnp.where(hit, col_f, n_f), axis=-1, keepdims=True)  # tie: lowest col
                onehot = col_f == idx                                              # one True per row
                sel_ref[b, (k_base + k) * n:(k_base + k + 1) * n, :] = onehot.astype(gather_dtype)
                s = jnp.where(onehot, big, s)

        # inner candidates first (self-loop forced first, matches dense-KNN d(self)=0);
        # score_inner dies before the cross mask is materialized.
        run_topk(jnp.where(diag, -big, jnp.where(same_set, score, big)), inner_k, 0)
        run_topk(jnp.where(same_set, big, score), cross_k, inner_k)

    # Stack batch items along the (8-aligned) sublane axis -> one big M dim for the conv matmuls.
    cur = jnp.concatenate(xy_slabs, axis=0) if bb > 1 else xy_slabs[0]    # (Bb*N, C) f32

    # ---------------- conv_times x (MRConv2d + residual) ----------------------------------------
    for l in range(conv_times):
        wl = w_ref[l]              # (2C, C)  conv weight^T with BN(eval) scale folded in
        sh = shift_ref[l]          # (1, C)   folded conv bias + BN shift

        # Per-item gather: one (K*N, N) @ (N, C) MXU matmul, then elementwise max over K slabs.
        maxj_slabs = []
        for b in range(bb):
            cur_b = cur[b * n:(b + 1) * n]
            gathered = jnp.dot(sel_ref[b], cur_b.astype(gather_dtype),
                               preferred_element_type=f32)                # (K*N, C)
            mj = gathered[0:n]
            for k in range(1, k_total):                                   # N % 8 == 0 -> aligned slabs
                mj = jnp.maximum(mj, gathered[k * n:(k + 1) * n])
            maxj_slabs.append(mj)
        maxj = jnp.concatenate(maxj_slabs, axis=0) if bb > 1 else maxj_slabs[0]
        max_rel = maxj - cur       # max_k (x_j - x_i) == (max_k x_j) - x_i

        # Fused 2C->C conv over the whole (Bb*N) row block: ONE MXU matmul per layer.
        feat = jnp.concatenate([cur, max_rel], axis=1)                    # (Bb*N, 2C)
        h = jnp.dot(feat, wl, preferred_element_type=f32) + sh
        h = jnp.maximum(h, 0.0)    # act='relu'; BN(eval) already folded into wl/sh
        cur = h + cur              # residual

    # Split + back to channels-first, written straight into the caller's NCHW-squeezed layout.
    for b in range(bb):
        cur_b = cur[b * n:(b + 1) * n]
        xo_ref[b] = jnp.transpose(cur_b[0:nx])     # (C, Nx)
        yo_ref[b] = jnp.transpose(cur_b[nx:n])     # (C, Ny)


def _default_vmem_limit_bytes():
    try:
        kind = jax.devices()[0].device_kind.lower()
    except Exception:
        kind = ""
    if "v7" in kind:
        return 48 * 1024 * 1024      # v7x: 64 MiB physical VMEM per TC -> leave headroom
    return 100 * 1024 * 1024         # v5e/v6e (and others): 128 MiB physical VMEM


def mdy_graph_conv2d(x, y, params, inner_k, cross_k, *, batch_block=None,
                     gather_dtype=jnp.float32, vmem_limit_bytes=None):
    """x: (B, C, Nx, 1), y: (B, C, Ny, 1) (PyTorch NCHW). Returns (x, y), same shapes.

    gather_dtype=jnp.bfloat16 uses the bf16 MXU path for the gather matmuls on v6e/v7x and
    halves the selection-matrix VMEM (rounds the gathered neighbour copies); keep f32 on v5e
    or when exact agreement with an f32 reference is required.
    """
    B, C, Nx, _ = x.shape
    Ny = y.shape[2]
    N = Nx + Ny
    w, shift = params                                  # (L, 2C, C), (L, 1, C)
    L = w.shape[0]

    assert N % 8 == 0, "Nx + Ny must be a multiple of 8 (pad points upstream)"
    assert inner_k <= min(Nx, Ny), "inner_k must not exceed the smaller point set"
    assert cross_k <= min(Nx, Ny), "cross_k must not exceed the smaller point set"

    if batch_block is None:
        # Largest divisor of B up to 8 (amortizes per-grid-step overhead at small N).
        # On v7x with tiny B, batch_block=B//2 keeps both TensorCores busy instead.
        batch_block = 1
        for cand in range(min(B, 8), 0, -1):
            if B % cand == 0:
                batch_block = cand
                break
    assert B % batch_block == 0, "batch_block must divide B"

    x3 = x[..., 0].astype(jnp.float32)                 # (B, C, Nx) -- free squeeze, no transpose
    y3 = y[..., 0].astype(jnp.float32)                 # (B, C, Ny)

    kernel = functools.partial(_fused_mdgc_kernel, nx=Nx, ny=Ny,
                               inner_k=inner_k, cross_k=cross_k,
                               conv_times=L, gather_dtype=gather_dtype)

    # TODO(synk): for large N (per-item (N,N) score + (K*N,N) selection no longer VMEM-resident,
    # threshold ~2x lower on v7x's 64 MiB) split into a KNN/selection kernel plus row-tiled
    # MRConv kernels (grid=(B, N//tm)).
    # TODO(synk): for large L*C, give the grid-invariant w/shift specs pipeline_mode=pl.Buffered(1)
    # (or DMA them once to scratch) to avoid double-buffering them.
    xo, yo = pl.pallas_call(
        kernel,
        out_shape=(jax.ShapeDtypeStruct((B, C, Nx), jnp.float32),
                   jax.ShapeDtypeStruct((B, C, Ny), jnp.float32)),
        grid_spec=pltpu.PrefetchScalarGridSpec(
            num_scalar_prefetch=0,
            grid=(B // batch_block,),
            in_specs=[
                pl.BlockSpec((batch_block, C, Nx), lambda g: (g, 0, 0)),
                pl.BlockSpec((batch_block, C, Ny), lambda g: (g, 0, 0)),
                pl.BlockSpec((L, 2 * C, C), lambda g: (0, 0, 0)),
                pl.BlockSpec((L, 1, C), lambda g: (0, 0, 0)),
            ],
            out_specs=[
                pl.BlockSpec((batch_block, C, Nx), lambda g: (g, 0, 0)),
                pl.BlockSpec((batch_block, C, Ny), lambda g: (g, 0, 0)),
            ],
            scratch_shapes=[
                pltpu.VMEM((batch_block, (inner_k + cross_k) * N, N), gather_dtype),
            ],
        ),
        compiler_params=pltpu.CompilerParams(
            dimension_semantics=("parallel",),          # megacore-shard batch groups on v7x
            vmem_limit_bytes=(vmem_limit_bytes if vmem_limit_bytes is not None
                              else _default_vmem_limit_bytes()),
        ),
    )(x3, y3, w, shift)

    return xo[..., None], yo[..., None]                # free reshapes back to NCHW (B,C,N,1)


def init_params(key, in_channels, conv_times):
    """Per layer Conv2d(2C->C, 1x1, bias) + BatchNorm2d(C) in eval mode, folded into (w, shift)."""
    C = in_channels
    eps = 1e-5
    ws, shifts = [], []
    for _ in range(conv_times):
        key, k1, k2, k3, k4 = jax.random.split(key, 5)
        w = jax.random.normal(k1, (2 * C, C), jnp.float32) / jnp.sqrt(2.0 * C)  # conv weight^T
        b = 0.01 * jax.random.normal(k2, (1, C), jnp.float32)
        gamma = 1.0 + 0.05 * jax.random.normal(k3, (1, C), jnp.float32)
        beta = 0.05 * jax.random.normal(k4, (1, C), jnp.float32)
        running_mean = jnp.zeros((1, C), jnp.float32)
        running_var = jnp.ones((1, C), jnp.float32)
        scale = gamma / jnp.sqrt(running_var + eps)
        # fold BN(eval) + conv bias into the weights (no per-layer scale/shift work in-kernel)
        ws.append(w * scale)                                 # rows 0..C-1: xy part, C..2C-1: max_rel
        shifts.append(b * scale + (beta - running_mean * scale))
    return jnp.stack(ws, axis=0), jnp.stack(shifts, axis=0)  # (L, 2C, C), (L, 1, C)


def _reference(x, y, params, inner_k, cross_k):
    """Pure-JAX reference (lax.top_k KNN + gather) for validation."""
    Nx = x.shape[2]
    xp = jnp.transpose(x[..., 0], (0, 2, 1))
    yp = jnp.transpose(y[..., 0], (0, 2, 1))
    xy = jnp.concatenate([xp, yp], axis=1)                   # (B, N, C)
    sq = jnp.sum(xy * xy, axis=-1)
    d = sq[:, :, None] + sq[:, None, :] - 2.0 * jnp.einsum('bnc,bmc->bnm', xy, xy)
    _, x_in = lax.top_k(-d[:, :Nx, :Nx], inner_k)
    _, x_cr = lax.top_k(-d[:, :Nx, Nx:], cross_k)
    _, y_in = lax.top_k(-d[:, Nx:, Nx:], inner_k)
    _, y_cr = lax.top_k(-d[:, Nx:, :Nx], cross_k)
    idx = jnp.concatenate([jnp.concatenate([x_in, x_cr + Nx], -1),
                           jnp.concatenate([y_in + Nx, y_cr], -1)], axis=1)
    W, shift = params
    cur = xy
    for l in range(W.shape[0]):
        gathered = jax.vmap(lambda c, ii: c[ii])(cur, idx)   # (B, N, K, C)
        max_rel = jnp.max(gathered, axis=2) - cur
        feat = jnp.concatenate([cur, max_rel], axis=-1)
        h = jnp.einsum('bnc,cd->bnd', feat, W[l]) + shift[l]
        cur = jnp.maximum(h, 0.0) + cur
    return (jnp.transpose(cur[:, :Nx], (0, 2, 1))[..., None],
            jnp.transpose(cur[:, Nx:], (0, 2, 1))[..., None])


if __name__ == "__main__":
    B, C, Nx, Ny = 2, 32, 16, 8
    inner_k, cross_k, conv_times = 4, 2, 2

    key = jax.random.PRNGKey(0)
    kx, ky, kp = jax.random.split(key, 3)
    x = jax.random.normal(kx, (B, C, Nx, 1), jnp.float32)
    y = jax.random.normal(ky, (B, C, Ny, 1), jnp.float32)
    params = init_params(kp, C, conv_times)

    x_out, y_out = mdy_graph_conv2d(x, y, params, inner_k, cross_k)
    jax.block_until_ready((x_out, y_out))
    assert x_out.shape == (B, C, Nx, 1) and y_out.shape == (B, C, Ny, 1)

    x_ref, y_ref = _reference(x, y, params, inner_k, cross_k)
    assert jnp.allclose(x_out, x_ref, atol=1e-3, rtol=1e-3)
    assert jnp.allclose(y_out, y_ref, atol=1e-3, rtol=1e-3)
    print("KERNEL_OK")
</pallas_src>

<mosaic_0001>
module attributes {stable_mosaic.version = 11 : i64} {
  func.func @_fused_mdgc_kernel(%arg0: i32, %arg1: memref<2x32x16xf32, #tpu.memory_space<vmem>>, %arg2: memref<2x32x8xf32, #tpu.memory_space<vmem>>, %arg3: memref<2x64x32xf32, #tpu.memory_space<vmem>>, %arg4: memref<2x1x32xf32, #tpu.memory_space<vmem>>, %arg5: memref<2x32x16xf32, #tpu.memory_space<vmem>>, %arg6: memref<2x32x8xf32, #tpu.memory_space<vmem>>, %arg7: memref<2x144x24xf32, #tpu.memory_space<vmem>>) attributes {dimension_semantics = [#tpu.dimension_semantics<parallel>], iteration_bounds = array<i64: 1>, scalar_prefetch = 0 : i64, scratch_operands = 1 : i64, tpu.core_type = #tpu.core_type<tc>, window_params = [{transform_indices = @transform_0, window_bounds = array<i64: 2, 32, 16>}, {transform_indices = @transform_1, window_bounds = array<i64: 2, 32, 8>}, {pipeline_mode = #tpu.pipeline_mode<synchronous>, transform_indices = @transform_2, window_bounds = array<i64: 2, 64, 32>}, {pipeline_mode = #tpu.pipeline_mode<synchronous>, transform_indices = @transform_3, window_bounds = array<i64: 2, 1, 32>}, {transform_indices = @transform_4, window_bounds = array<i64: 2, 32, 16>}, {transform_indices = @transform_5, window_bounds = array<i64: 2, 32, 8>}]} {
    %0 = tpu.iota {dimensions = array<i32: 0>} : vector<24x24xi32>
    %1 = tpu.iota {dimensions = array<i32: 1>} : vector<24x24xi32>
    %2 = arith.sitofp %1 : vector<24x24xi32> to vector<24x24xf32>
    %c16_i32 = arith.constant 16 : i32
    %3 = vector.broadcast %c16_i32 : i32 to vector<24x24xi32>
    %4 = arith.cmpi slt, %0, %3 : vector<24x24xi32>
    %c16_i32_0 = arith.constant 16 : i32
    %5 = vector.broadcast %c16_i32_0 : i32 to vector<24x24xi32>
    %6 = arith.cmpi slt, %1, %5 : vector<24x24xi32>
    %7 = arith.xori %4, %6 : vector<24x24xi1>
    %cst = arith.constant dense<true> : vector<24x24xi1>
    %8 = arith.xori %7, %cst : vector<24x24xi1>
    %9 = arith.cmpi eq, %0, %1 : vector<24x24xi32>
    %c0 = arith.constant 0 : index
    %c0_1 = arith.constant 0 : index
    %c0_2 = arith.constant 0 : index
    %10 = vector.load %arg1[%c0, %c0_1, %c0_2] : memref<2x32x16xf32, #tpu.memory_space<vmem>>, vector<1x32x16xf32>
    %11 = vector.shape_cast %10 : vector<1x32x16xf32> to vector<32x16xf32>
    %12 = tpu.transpose %11, [1, 0] : vector<32x16xf32> -> vector<16x32xf32>
    %c0_3 = arith.constant 0 : index
    %c0_4 = arith.constant 0 : index
    %c0_5 = arith.constant 0 : index
    %13 = vector.load %arg2[%c0_3, %c0_4, %c0_5] : memref<2x32x8xf32, #tpu.memory_space<vmem>>, vector<1x32x8xf32>
    %14 = vector.shape_cast %13 : vector<1x32x8xf32> to vector<32x8xf32>
    %15 = tpu.transpose %14, [1, 0] : vector<32x8xf32> -> vector<8x32xf32>
    %16 = tpu.concatenate %12, %15 in 0 : vector<16x32xf32>, vector<8x32xf32> -> vector<24x32xf32>
    %17 = arith.mulf %16, %16 : vector<24x32xf32>
    %cst_6 = arith.constant dense<0.000000e+00> : vector<24xf32>
    %18 = vector.multi_reduction <add>, %17, %cst_6 [1] : vector<24x32xf32> to vector<24xf32>
    %19 = vector.shape_cast %18 : vector<24xf32> to vector<24x1xf32>
    %cst_7 = arith.constant -2.000000e+00 : f32
    %20 = vector.broadcast %cst_7 : f32 to vector<24x32xf32>
    %21 = arith.mulf %20, %16 : vector<24x32xf32>
    %cst_8 = arith.constant 1.000000e+00 : f32
    %22 = vector.broadcast %cst_8 : f32 to vector<24x1xf32>
    %23 = tpu.concatenate %21, %22 in 1 : vector<24x32xf32>, vector<24x1xf32> -> vector<24x33xf32>
    %24 = tpu.concatenate %16, %19 in 1 : vector<24x32xf32>, vector<24x1xf32> -> vector<24x33xf32>
    %cst_9 = arith.constant dense<0.000000e+00> : vector<24x24xf32>
    %25 = tpu.matmul %23, %24, %cst_9 {dimension_numbers = #tpu.dot_dimension_numbers<[1], [1], [0], [0], [0, 0, 1, 0], [], []>} : vector<24x33xf32>, vector<24x33xf32>, vector<24x24xf32> -> vector<24x24xf32>
    %cst_10 = arith.constant 1.000000e+30 : f32
    %26 = vector.broadcast %cst_10 : f32 to vector<24x24xf32>
    %27 = arith.select %8, %25, %26 : vector<24x24xi1>, vector<24x24xf32>
    %cst_11 = arith.constant -1.000000e+30 : f32
    %28 = vector.broadcast %cst_11 : f32 to vector<24x24xf32>
    %29 = arith.select %9, %28, %27 : vector<24x24xi1>, vector<24x24xf32>
    %cst_12 = arith.constant dense<0x7F800000> : vector<24xf32>
    %30 = vector.multi_reduction <minimumf>, %29, %cst_12 [1] : vector<24x24xf32> to vector<24xf32>
    %31 = vector.shape_cast %30 : vector<24xf32> to vector<24x1xf32>
    %32 = vector.broadcast %31 : vector<24x1xf32> to vector<24x24xf32>
    %33 = arith.cmpf ole, %29, %32 : vector<24x24xf32>
    %cst_13 = arith.constant 2.400000e+01 : f32
    %34 = vector.broadcast %cst_13 : f32 to vector<24x24xf32>
    %35 = arith.select %33, %2, %34 : vector<24x24xi1>, vector<24x24xf32>
    %cst_14 = arith.constant dense<0x7F800000> : vector<24xf32>
    %36 = vector.multi_reduction <minimumf>, %35, %cst_14 [1] : vector<24x24xf32> to vector<24xf32>
    %37 = vector.shape_cast %36 : vector<24xf32> to vector<24x1xf32>
    %38 = vector.broadcast %37 : vector<24x1xf32> to vector<24x24xf32>
    %39 = arith.cmpf oeq, %2, %38 : vector<24x24xf32>
    %40 = arith.extui %39 : vector<24x24xi1> to vector<24x24xi32>
    %41 = arith.sitofp %40 : vector<24x24xi32> to vector<24x24xf32>
    %c0_15 = arith.constant 0 : index
    %c0_16 = arith.constant 0 : index
    %c0_17 = arith.constant 0 : index
    %42 = vector.load %arg7[%c0_15, %c0_16, %c0_17] : memref<2x144x24xf32, #tpu.memory_space<vmem>>, vector<1x24x24xf32>
    %43 = vector.shape_cast %42 : vector<1x24x24xf32> to vector<24x24xf32>
    %44 = vector.shape_cast %41 : vector<24x24xf32> to vector<1x24x24xf32>
    tpu.vector_store %arg7[%c0_15, %c0_16, %c0_17], %44 {strides = array<i32>} : memref<2x144x24xf32, #tpu.memory_space<vmem>>, vector<1x24x24xf32>,
    %cst_18 = arith.constant 1.000000e+30 : f32
    %45 = vector.broadcast %cst_18 : f32 to vector<24x24xf32>
    %46 = arith.select %39, %45, %29 : vector<24x24xi1>, vector<24x24xf32>
    %cst_19 = arith.constant dense<0x7F800000> : vector<24xf32>
    %47 = vector.multi_reduction <minimumf>, %46, %cst_19 [1] : vector<24x24xf32> to vector<24xf32>
    %48 = vector.shape_cast %47 : vector<24xf32> to vector<24x1xf32>
    %49 = vector.broadcast %48 : vector<24x1xf32> to vector<24x24xf32>
    %50 = arith.cmpf ole, %46, %49 : vector<24x24xf32>
    %cst_20 = arith.constant 2.400000e+01 : f32
    %51 = vector.broadcast %cst_20 : f32 to vector<24x24xf32>
    %52 = arith.select %50, %2, %51 : vector<24x24xi1>, vector<24x24xf32>
    %cst_21 = arith.constant dense<0x7F800000> : vector<24xf32>
    %53 = vector.multi_reduction <minimumf>, %52, %cst_21 [1] : vector<24x24xf32> to vector<24xf32>
    %54 = vector.shape_cast %53 : vector<24xf32> to vector<24x1xf32>
    %55 = vector.broadcast %54 : vector<24x1xf32> to vector<24x24xf32>
    %56 = arith.cmpf oeq, %2, %55 : vector<24x24xf32>
    %57 = arith.extui %56 : vector<24x24xi1> to vector<24x24xi32>
    %58 = arith.sitofp %57 : vector<24x24xi32> to vector<24x24xf32>
    %c0_22 = arith.constant 0 : index
    %c24 = arith.constant 24 : index
    %c0_23 = arith.constant 0 : index
    %59 = vector.load %arg7[%c0_22, %c24, %c0_23] : memref<2x144x24xf32, #tpu.memory_space<vmem>>, vector<1x24x24xf32>
    %60 = vector.shape_cast %59 : vector<1x24x24xf32> to vector<24x24xf32>
    %61 = vector.shape_cast %58 : vector<24x24xf32> to vector<1x24x24xf32>
    tpu.vector_store %arg7[%c0_22, %c24, %c0_23], %61 {strides = array<i32>} : memref<2x144x24xf32, #tpu.memory_space<vmem>>, vector<1x24x24xf32>,
    %cst_24 = arith.constant 1.000000e+30 : f32
    %62 = vector.broadcast %cst_24 : f32 to vector<24x24xf32>
    %63 = arith.select %56, %62, %46 : vector<24x24xi1>, vector<24x24xf32>
    %cst_25 = arith.constant dense<0x7F800000> : vector<24xf32>
    %64 = vector.multi_reduction <minimumf>, %63, %cst_25 [1] : vector<24x24xf32> to vector<24xf32>
    %65 = vector.shape_cast %64 : vector<24xf32> to vector<24x1xf32>
    %66 = vector.broadcast %65 : vector<24x1xf32> to vector<24x24xf32>
    %67 = arith.cmpf ole, %63, %66 : vector<24x24xf32>
    %cst_26 = arith.constant 2.400000e+01 : f32
    %68 = vector.broadcast %cst_26 : f32 to vector<24x24xf32>
    %69 = arith.select %67, %2, %68 : vector<24x24xi1>, vector<24x24xf32>
    %cst_27 = arith.constant dense<0x7F800000> : vector<24xf32>
    %70 = vector.multi_reduction <minimumf>, %69, %cst_27 [1] : vector<24x24xf32> to vector<24xf32>
    %71 = vector.shape_cast %70 : vector<24xf32> to vector<24x1xf32>
    %72 = vector.broadcast %71 : vector<24x1xf32> to vector<24x24xf32>
    %73 = arith.cmpf oeq, %2, %72 : vector<24x24xf32>
    %74 = arith.extui %73 : vector<24x24xi1> to vector<24x24xi32>
    %75 = arith.sitofp %74 : vector<24x24xi32> to vector<24x24xf32>
    %c0_28 = arith.constant 0 : index
    %c48 = arith.constant 48 : index
    %c0_29 = arith.constant 0 : index
    %76 = vector.load %arg7[%c0_28, %c48, %c0_29] : memref<2x144x24xf32, #tpu.memory_space<vmem>>, vector<1x24x24xf32>
    %77 = vector.shape_cast %76 : vector<1x24x24xf32> to vector<24x24xf32>
    %78 = vector.shape_cast %75 : vector<24x24xf32> to vector<1x24x24xf32>
    tpu.vector_store %arg7[%c0_28, %c48, %c0_29], %78 {strides = array<i32>} : memref<2x144x24xf32, #tpu.memory_space<vmem>>, vector<1x24x24xf32>,
    %cst_30 = arith.constant 1.000000e+30 : f32
    %79 = vector.broadcast %cst_30 : f32 to vector<24x24xf32>
    %80 = arith.select %73, %79, %63 : vector<24x24xi1>, vector<24x24xf32>
    %cst_31 = arith.constant dense<0x7F800000> : vector<24xf32>
    %81 = vector.multi_reduction <minimumf>, %80, %cst_31 [1] : vector<24x24xf32> to vector<24xf32>
    %82 = vector.shape_cast %81 : vector<24xf32> to vector<24x1xf32>
    %83 = vector.broadcast %82 : vector<24x1xf32> to vector<24x24xf32>
    %84 = arith.cmpf ole, %80, %83 : vector<24x24xf32>
    %cst_32 = arith.constant 2.400000e+01 : f32
    %85 = vector.broadcast %cst_32 : f32 to vector<24x24xf32>
    %86 = arith.select %84, %2, %85 : vector<24x24xi1>, vector<24x24xf32>
    %cst_33 = arith.constant dense<0x7F800000> : vector<24xf32>
    %87 = vector.multi_reduction <minimumf>, %86, %cst_33 [1] : vector<24x24xf32> to vector<24xf32>
    %88 = vector.shape_cast %87 : vector<24xf32> to vector<24x1xf32>
    %89 = vector.broadcast %88 : vector<24x1xf32> to vector<24x24xf32>
    %90 = arith.cmpf oeq, %2, %89 : vector<24x24xf32>
    %91 = arith.extui %90 : vector<24x24xi1> to vector<24x24xi32>
    %92 = arith.sitofp %91 : vector<24x24xi32> to vector<24x24xf32>
    %c0_34 = arith.constant 0 : index
    %c72 = arith.constant 72 : index
    %c0_35 = arith.constant 0 : index
    %93 = vector.load %arg7[%c0_34, %c72, %c0_35] : memref<2x144x24xf32, #tpu.memory_space<vmem>>, vector<1x24x24xf32>
    %94 = vector.shape_cast %93 : vector<1x24x24xf32> to vector<24x24xf32>
    %95 = vector.shape_cast %92 : vector<24x24xf32> to vector<1x24x24xf32>
    tpu.vector_store %arg7[%c0_34, %c72, %c0_35], %95 {strides = array<i32>} : memref<2x144x24xf32, #tpu.memory_space<vmem>>, vector<1x24x24xf32>,
    %cst_36 = arith.constant 1.000000e+30 : f32
    %96 = vector.broadcast %cst_36 : f32 to vector<24x24xf32>
    %97 = arith.select %8, %96, %25 : vector<24x24xi1>, vector<24x24xf32>
    %cst_37 = arith.constant dense<0x7F800000> : vector<24xf32>
    %98 = vector.multi_reduction <minimumf>, %97, %cst_37 [1] : vector<24x24xf32> to vector<24xf32>
    %99 = vector.shape_cast %98 : vector<24xf32> to vector<24x1xf32>
    %100 = vector.broadcast %99 : vector<24x1xf32> to vector<24x24xf32>
    %101 = arith.cmpf ole, %97, %100 : vector<24x24xf32>
    %cst_38 = arith.constant 2.400000e+01 : f32
    %102 = vector.broadcast %cst_38 : f32 to vector<24x24xf32>
    %103 = arith.select %101, %2, %102 : vector<24x24xi1>, vector<24x24xf32>
    %cst_39 = arith.constant dense<0x7F800000> : vector<24xf32>
    %104 = vector.multi_reduction <minimumf>, %103, %cst_39 [1] : vector<24x24xf32> to vector<24xf32>
    %105 = vector.shape_cast %104 : vector<24xf32> to vector<24x1xf32>
    %106 = vector.broadcast %105 : vector<24x1xf32> to vector<24x24xf32>
    %107 = arith.cmpf oeq, %2, %106 : vector<24x24xf32>
    %108 = arith.extui %107 : vector<24x24xi1> to vector<24x24xi32>
    %109 = arith.sitofp %108 : vector<24x24xi32> to vector<24x24xf32>
    %c0_40 = arith.constant 0 : index
    %c96 = arith.constant 96 : index
    %c0_41 = arith.constant 0 : index
    %110 = vector.load %arg7[%c0_40, %c96, %c0_41] : memref<2x144x24xf32, #tpu.memory_space<vmem>>, vector<1x24x24xf32>
    %111 = vector.shape_cast %110 : vector<1x24x24xf32> to vector<24x24xf32>
    %112 = vector.shape_cast %109 : vector<24x24xf32> to vector<1x24x24xf32>
    tpu.vector_store %arg7[%c0_40, %c96, %c0_41], %112 {strides = array<i32>} : memref<2x144x24xf32, #tpu.memory_space<vmem>>, vector<1x24x24xf32>,
    %cst_42 = arith.constant 1.000000e+30 : f32
    %113 = vector.broadcast %cst_42 : f32 to vector<24x24xf32>
    %114 = arith.select %107, %113, %97 : vector<24x24xi1>, vector<24x24xf32>
    %cst_43 = arith.constant dense<0x7F800000> : vector<24xf32>
    %115 = vector.multi_reduction <minimumf>, %114, %cst_43 [1] : vector<24x24xf32> to vector<24xf32>
    %116 = vector.shape_cast %115 : vector<24xf32> to vector<24x1xf32>
    %117 = vector.broadcast %116 : vector<24x1xf32> to vector<24x24xf32>
    %118 = arith.cmpf ole, %114, %117 : vector<24x24xf32>
    %cst_44 = arith.constant 2.400000e+01 : f32
    %119 = vector.broadcast %cst_44 : f32 to vector<24x24xf32>
    %120 = arith.select %118, %2, %119 : vector<24x24xi1>, vector<24x24xf32>
    %cst_45 = arith.constant dense<0x7F800000> : vector<24xf32>
    %121 = vector.multi_reduction <minimumf>, %120, %cst_45 [1] : vector<24x24xf32> to vector<24xf32>
    %122 = vector.shape_cast %121 : vector<24xf32> to vector<24x1xf32>
    %123 = vector.broadcast %122 : vector<24x1xf32> to vector<24x24xf32>
    %124 = arith.cmpf oeq, %2, %123 : vector<24x24xf32>
    %125 = arith.extui %124 : vector<24x24xi1> to vector<24x24xi32>
    %126 = arith.sitofp %125 : vector<24x24xi32> to vector<24x24xf32>
    %c0_46 = arith.constant 0 : index
    %c120 = arith.constant 120 : index
    %c0_47 = arith.constant 0 : index
    %127 = vector.load %arg7[%c0_46, %c120, %c0_47] : memref<2x144x24xf32, #tpu.memory_space<vmem>>, vector<1x24x24xf32>
    %128 = vector.shape_cast %127 : vector<1x24x24xf32> to vector<24x24xf32>
    %129 = vector.shape_cast %126 : vector<24x24xf32> to vector<1x24x24xf32>
    tpu.vector_store %arg7[%c0_46, %c120, %c0_47], %129 {strides = array<i32>} : memref<2x144x24xf32, #tpu.memory_space<vmem>>, vector<1x24x24xf32>,
    %c1 = arith.constant 1 : index
    %c0_48 = arith.constant 0 : index
    %c0_49 = arith.constant 0 : index
    %130 = vector.load %arg1[%c1, %c0_48, %c0_49] : memref<2x32x16xf32, #tpu.memory_space<vmem>>, vector<1x32x16xf32>
    %131 = vector.shape_cast %130 : vector<1x32x16xf32> to vector<32x16xf32>
    %132 = tpu.transpose %131, [1, 0] : vector<32x16xf32> -> vector<16x32xf32>
    %c1_50 = arith.constant 1 : index
    %c0_51 = arith.constant 0 : index
    %c0_52 = arith.constant 0 : index
    %133 = vector.load %arg2[%c1_50, %c0_51, %c0_52] : memref<2x32x8xf32, #tpu.memory_space<vmem>>, vector<1x32x8xf32>
    %134 = vector.shape_cast %133 : vector<1x32x8xf32> to vector<32x8xf32>
    %135 = tpu.transpose %134, [1, 0] : vector<32x8xf32> -> vector<8x32xf32>
    %136 = tpu.concatenate %132, %135 in 0 : vector<16x32xf32>, vector<8x32xf32> -> vector<24x32xf32>
    %137 = arith.mulf %136, %136 : vector<24x32xf32>
    %cst_53 = arith.constant dense<0.000000e+00> : vector<24xf32>
    %138 = vector.multi_reduction <add>, %137, %cst_53 [1] : vector<24x32xf32> to vector<24xf32>
    %139 = vector.shape_cast %138 : vector<24xf32> to vector<24x1xf32>
    %cst_54 = arith.constant -2.000000e+00 : f32
    %140 = vector.broadcast %cst_54 : f32 to vector<24x32xf32>
    %141 = arith.mulf %140, %136 : vector<24x32xf32>
    %cst_55 = arith.constant 1.000000e+00 : f32
    %142 = vector.broadcast %cst_55 : f32 to vector<24x1xf32>
    %143 = tpu.concatenate %141, %142 in 1 : vector<24x32xf32>, vector<24x1xf32> -> vector<24x33xf32>
    %144 = tpu.concatenate %136, %139 in 1 : vector<24x32xf32>, vector<24x1xf32> -> vector<24x33xf32>
    %cst_56 = arith.constant dense<0.000000e+00> : vector<24x24xf32>
    %145 = tpu.matmul %143, %144, %cst_56 {dimension_numbers = #tpu.dot_dimension_numbers<[1], [1], [0], [0], [0, 0, 1, 0], [], []>} : vector<24x33xf32>, vector<24x33xf32>, vector<24x24xf32> -> vector<24x24xf32>
    %cst_57 = arith.constant 1.000000e+30 : f32
    %146 = vector.broadcast %cst_57 : f32 to vector<24x24xf32>
    %147 = arith.select %8, %145, %146 : vector<24x24xi1>, vector<24x24xf32>
    %cst_58 = arith.constant -1.000000e+30 : f32
    %148 = vector.broadcast %cst_58 : f32 to vector<24x24xf32>
    %149 = arith.select %9, %148, %147 : vector<24x24xi1>, vector<24x24xf32>
    %cst_59 = arith.constant dense<0x7F800000> : vector<24xf32>
    %150 = vector.multi_reduction <minimumf>, %149, %cst_59 [1] : vector<24x24xf32> to vector<24xf32>
    %151 = vector.shape_cast %150 : vector<24xf32> to vector<24x1xf32>
    %152 = vector.broadcast %151 : vector<24x1xf32> to vector<24x24xf32>
    %153 = arith.cmpf ole, %149, %152 : vector<24x24xf32>
    %cst_60 = arith.constant 2.400000e+01 : f32
    %154 = vector.broadcast %cst_60 : f32 to vector<24x24xf32>
    %155 = arith.select %153, %2, %154 : vector<24x24xi1>, vector<24x24xf32>
    %cst_61 = arith.constant dense<0x7F800000> : vector<24xf32>
    %156 = vector.multi_reduction <minimumf>, %155, %cst_61 [1] : vector<24x24xf32> to vector<24xf32>
    %157 = vector.shape_cast %156 : vector<24xf32> to vector<24x1xf32>
    %158 = vector.broadcast %157 : vector<24x1xf32> to vector<24x24xf32>
    %159 = arith.cmpf oeq, %2, %158 : vector<24x24xf32>
    %160 = arith.extui %159 : vector<24x24xi1> to vector<24x24xi32>
    %161 = arith.sitofp %160 : vector<24x24xi32> to vector<24x24xf32>
    %c1_62 = arith.constant 1 : index
    %c0_63 = arith.constant 0 : index
    %c0_64 = arith.constant 0 : index
    %162 = vector.load %arg7[%c1_62, %c0_63, %c0_64] : memref<2x144x24xf32, #tpu.memory_space<vmem>>, vector<1x24x24xf32>
    %163 = vector.shape_cast %162 : vector<1x24x24xf32> to vector<24x24xf32>
    %164 = vector.shape_cast %161 : vector<24x24xf32> to vector<1x24x24xf32>
    tpu.vector_store %arg7[%c1_62, %c0_63, %c0_64], %164 {strides = array<i32>} : memref<2x144x24xf32, #tpu.memory_space<vmem>>, vector<1x24x24xf32>,
    %cst_65 = arith.constant 1.000000e+30 : f32
    %165 = vector.broadcast %cst_65 : f32 to vector<24x24xf32>
    %166 = arith.select %159, %165, %149 : vector<24x24xi1>, vector<24x24xf32>
    %cst_66 = arith.constant dense<0x7F800000> : vector<24xf32>
    %167 = vector.multi_reduction <minimumf>, %166, %cst_66 [1] : vector<24x24xf32> to vector<24xf32>
    %168 = vector.shape_cast %167 : vector<24xf32> to vector<24x1xf32>
    %169 = vector.broadcast %168 : vector<24x1xf32> to vector<24x24xf32>
    %170 = arith.cmpf ole, %166, %169 : vector<24x24xf32>
    %cst_67 = arith.constant 2.400000e+01 : f32
    %171 = vector.broadcast %cst_67 : f32 to vector<24x24xf32>
    %172 = arith.select %170, %2, %171 : vector<24x24xi1>, vector<24x24xf32>
    %cst_68 = arith.constant dense<0x7F800000> : vector<24xf32>
    %173 = vector.multi_reduction <minimumf>, %172, %cst_68 [1] : vector<24x24xf32> to vector<24xf32>
    %174 = vector.shape_cast %173 : vector<24xf32> to vector<24x1xf32>
    %175 = vector.broadcast %174 : vector<24x1xf32> to vector<24x24xf32>
    %176 = arith.cmpf oeq, %2, %175 : vector<24x24xf32>
    %177 = arith.extui %176 : vector<24x24xi1> to vector<24x24xi32>
    %178 = arith.sitofp %177 : vector<24x24xi32> to vector<24x24xf32>
    %c1_69 = arith.constant 1 : index
    %c24_70 = arith.constant 24 : index
    %c0_71 = arith.constant 0 : index
    %179 = vector.load %arg7[%c1_69, %c24_70, %c0_71] : memref<2x144x24xf32, #tpu.memory_space<vmem>>, vector<1x24x24xf32>
    %180 = vector.shape_cast %179 : vector<1x24x24xf32> to vector<24x24xf32>
    %181 = vector.shape_cast %178 : vector<24x24xf32> to vector<1x24x24xf32>
    tpu.vector_store %arg7[%c1_69, %c24_70, %c0_71], %181 {strides = array<i32>} : memref<2x144x24xf32, #tpu.memory_space<vmem>>, vector<1x24x24xf32>,
    %cst_72 = arith.constant 1.000000e+30 : f32
    %182 = vector.broadcast %cst_72 : f32 to vector<24x24xf32>
    %183 = arith.select %176, %182, %166 : vector<24x24xi1>, vector<24x24xf32>
    %cst_73 = arith.constant dense<0x7F800000> : vector<24xf32>
    %184 = vector.multi_reduction <minimumf>, %183, %cst_73 [1] : vector<24x24xf32> to vector<24xf32>
    %185 = vector.shape_cast %184 : vector<24xf32> to vector<24x1xf32>
    %186 = vector.broadcast %185 : vector<24x1xf32> to vector<24x24xf32>
    %187 = arith.cmpf ole, %183, %186 : vector<24x24xf32>
    %cst_74 = arith.constant 2.400000e+01 : f32
    %188 = vector.broadcast %cst_74 : f32 to vector<24x24xf32>
    %189 = arith.select %187, %2, %188 : vector<24x24xi1>, vector<24x24xf32>
    %cst_75 = arith.constant dense<0x7F800000> : vector<24xf32>
    %190 = vector.multi_reduction <minimumf>, %189, %cst_75 [1] : vector<24x24xf32> to vector<24xf32>
    %191 = vector.shape_cast %190 : vector<24xf32> to vector<24x1xf32>
    %192 = vector.broadcast %191 : vector<24x1xf32> to vector<24x24xf32>
    %193 = arith.cmpf oeq, %2, %192 : vector<24x24xf32>
    %194 = arith.extui %193 : vector<24x24xi1> to vector<24x24xi32>
    %195 = arith.sitofp %194 : vector<24x24xi32> to vector<24x24xf32>
    %c1_76 = arith.constant 1 : index
    %c48_77 = arith.constant 48 : index
    %c0_78 = arith.constant 0 : index
    %196 = vector.load %arg7[%c1_76, %c48_77, %c0_78] : memref<2x144x24xf32, #tpu.memory_space<vmem>>, vector<1x24x24xf32>
    %197 = vector.shape_cast %196 : vector<1x24x24xf32> to vector<24x24xf32>
    %198 = vector.shape_cast %195 : vector<24x24xf32> to vector<1x24x24xf32>
    tpu.vector_store %arg7[%c1_76, %c48_77, %c0_78], %198 {strides = array<i32>} : memref<2x144x24xf32, #tpu.memory_space<vmem>>, vector<1x24x24xf32>,
    %cst_79 = arith.constant 1.000000e+30 : f32
    %199 = vector.broadcast %cst_79 : f32 to vector<24x24xf32>
    %200 = arith.select %193, %199, %183 : vector<24x24xi1>, vector<24x24xf32>
    %cst_80 = arith.constant dense<0x7F800000> : vector<24xf32>
    %201 = vector.multi_reduction <minimumf>, %200, %cst_80 [1] : vector<24x24xf32> to vector<24xf32>
    %202 = vector.shape_cast %201 : vector<24xf32> to vector<24x1xf32>
    %203 = vector.broadcast %202 : vector<24x1xf32> to vector<24x24xf32>
    %204 = arith.cmpf ole, %200, %203 : vector<24x24xf32>
    %cst_81 = arith.constant 2.400000e+01 : f32
    %205 = vector.broadcast %cst_81 : f32 to vector<24x24xf32>
    %206 = arith.select %204, %2, %205 : vector<24x24xi1>, vector<24x24xf32>
    %cst_82 = arith.constant dense<0x7F800000> : vector<24xf32>
    %207 = vector.multi_reduction <minimumf>, %206, %cst_82 [1] : vector<24x24xf32> to vector<24xf32>
    %208 = vector.shape_cast %207 : vector<24xf32> to vector<24x1xf32>
    %209 = vector.broadcast %208 : vector<24x1xf32> to vector<24x24xf32>
    %210 = arith.cmpf oeq, %2, %209 : vector<24x24xf32>
    %211 = arith.extui %210 : vector<24x24xi1> to vector<24x24xi32>
    %212 = arith.sitofp %211 : vector<24x24xi32> to vector<24x24xf32>
    %c1_83 = arith.constant 1 : index
    %c72_84 = arith.constant 72 : index
    %c0_85 = arith.constant 0 : index
    %213 = vector.load %arg7[%c1_83, %c72_84, %c0_85] : memref<2x144x24xf32, #tpu.memory_space<vmem>>, vector<1x24x24xf32>
    %214 = vector.shape_cast %213 : vector<1x24x24xf32> to vector<24x24xf32>
    %215 = vector.shape_cast %212 : vector<24x24xf32> to vector<1x24x24xf32>
    tpu.vector_store %arg7[%c1_83, %c72_84, %c0_85], %215 {strides = array<i32>} : memref<2x144x24xf32, #tpu.memory_space<vmem>>, vector<1x24x24xf32>,
    %cst_86 = arith.constant 1.000000e+30 : f32
    %216 = vector.broadcast %cst_86 : f32 to vector<24x24xf32>
    %217 = arith.select %8, %216, %145 : vector<24x24xi1>, vector<24x24xf32>
    %cst_87 = arith.constant dense<0x7F800000> : vector<24xf32>
    %218 = vector.multi_reduction <minimumf>, %217, %cst_87 [1] : vector<24x24xf32> to vector<24xf32>
    %219 = vector.shape_cast %218 : vector<24xf32> to vector<24x1xf32>
    %220 = vector.broadcast %219 : vector<24x1xf32> to vector<24x24xf32>
    %221 = arith.cmpf ole, %217, %220 : vector<24x24xf32>
    %cst_88 = arith.constant 2.400000e+01 : f32
    %222 = vector.broadcast %cst_88 : f32 to vector<24x24xf32>
    %223 = arith.select %221, %2, %222 : vector<24x24xi1>, vector<24x24xf32>
    %cst_89 = arith.constant dense<0x7F800000> : vector<24xf32>
    %224 = vector.multi_reduction <minimumf>, %223, %cst_89 [1] : vector<24x24xf32> to vector<24xf32>
    %225 = vector.shape_cast %224 : vector<24xf32> to vector<24x1xf32>
    %226 = vector.broadcast %225 : vector<24x1xf32> to vector<24x24xf32>
    %227 = arith.cmpf oeq, %2, %226 : vector<24x24xf32>
    %228 = arith.extui %227 : vector<24x24xi1> to vector<24x24xi32>
    %229 = arith.sitofp %228 : vector<24x24xi32> to vector<24x24xf32>
    %c1_90 = arith.constant 1 : index
    %c96_91 = arith.constant 96 : index
    %c0_92 = arith.constant 0 : index
    %230 = vector.load %arg7[%c1_90, %c96_91, %c0_92] : memref<2x144x24xf32, #tpu.memory_space<vmem>>, vector<1x24x24xf32>
    %231 = vector.shape_cast %230 : vector<1x24x24xf32> to vector<24x24xf32>
    %232 = vector.shape_cast %229 : vector<24x24xf32> to vector<1x24x24xf32>
    tpu.vector_store %arg7[%c1_90, %c96_91, %c0_92], %232 {strides = array<i32>} : memref<2x144x24xf32, #tpu.memory_space<vmem>>, vector<1x24x24xf32>,
    %cst_93 = arith.constant 1.000000e+30 : f32
    %233 = vector.broadcast %cst_93 : f32 to vector<24x24xf32>
    %234 = arith.select %227, %233, %217 : vector<24x24xi1>, vector<24x24xf32>
    %cst_94 = arith.constant dense<0x7F800000> : vector<24xf32>
    %235 = vector.multi_reduction <minimumf>, %234, %cst_94 [1] : vector<24x24xf32> to vector<24xf32>
    %236 = vector.shape_cast %235 : vector<24xf32> to vector<24x1xf32>
    %237 = vector.broadcast %236 : vector<24x1xf32> to vector<24x24xf32>
    %238 = arith.cmpf ole, %234, %237 : vector<24x24xf32>
    %cst_95 = arith.constant 2.400000e+01 : f32
    %239 = vector.broadcast %cst_95 : f32 to vector<24x24xf32>
    %240 = arith.select %238, %2, %239 : vector<24x24xi1>, vector<24x24xf32>
    %cst_96 = arith.constant dense<0x7F800000> : vector<24xf32>
    %241 = vector.multi_reduction <minimumf>, %240, %cst_96 [1] : vector<24x24xf32> to vector<24xf32>
    %242 = vector.shape_cast %241 : vector<24xf32> to vector<24x1xf32>
    %243 = vector.broadcast %242 : vector<24x1xf32> to vector<24x24xf32>
    %244 = arith.cmpf oeq, %2, %243 : vector<24x24xf32>
    %245 = arith.extui %244 : vector<24x24xi1> to vector<24x24xi32>
    %246 = arith.sitofp %245 : vector<24x24xi32> to vector<24x24xf32>
    %c1_97 = arith.constant 1 : index
    %c120_98 = arith.constant 120 : index
    %c0_99 = arith.constant 0 : index
    %247 = vector.load %arg7[%c1_97, %c120_98, %c0_99] : memref<2x144x24xf32, #tpu.memory_space<vmem>>, vector<1x24x24xf32>
    %248 = vector.shape_cast %247 : vector<1x24x24xf32> to vector<24x24xf32>
    %249 = vector.shape_cast %246 : vector<24x24xf32> to vector<1x24x24xf32>
    tpu.vector_store %arg7[%c1_97, %c120_98, %c0_99], %249 {strides = array<i32>} : memref<2x144x24xf32, #tpu.memory_space<vmem>>, vector<1x24x24xf32>,
    %250 = tpu.concatenate %16, %136 in 0 : vector<24x32xf32>, vector<24x32xf32> -> vector<48x32xf32>
    %c0_100 = arith.constant 0 : index
    %c0_101 = arith.constant 0 : index
    %c0_102 = arith.constant 0 : index
    %251 = vector.load %arg3[%c0_100, %c0_101, %c0_102] : memref<2x64x32xf32, #tpu.memory_space<vmem>>, vector<1x64x32xf32>
    %252 = vector.shape_cast %251 : vector<1x64x32xf32> to vector<64x32xf32>
    %c0_103 = arith.constant 0 : index
    %c0_104 = arith.constant 0 : index
    %c0_105 = arith.constant 0 : index
    %253 = vector.load %arg4[%c0_103, %c0_104, %c0_105] : memref<2x1x32xf32, #tpu.memory_space<vmem>>, vector<1x1x32xf32>
    %254 = vector.shape_cast %253 : vector<1x1x32xf32> to vector<1x32xf32>
    %255 = vector.extract_strided_slice %250 {offsets = [0, 0], sizes = [24, 32], strides = [1, 1]} : vector<48x32xf32> to vector<24x32xf32>
    %c0_106 = arith.constant 0 : index
    %c0_107 = arith.constant 0 : index
    %c0_108 = arith.constant 0 : index
    %256 = vector.load %arg7[%c0_106, %c0_107, %c0_108] : memref<2x144x24xf32, #tpu.memory_space<vmem>>, vector<1x144x24xf32>
    %257 = vector.shape_cast %256 : vector<1x144x24xf32> to vector<144x24xf32>
    %cst_109 = arith.constant dense<0.000000e+00> : vector<144x32xf32>
    %258 = tpu.matmul %257, %255, %cst_109 {dimension_numbers = #tpu.dot_dimension_numbers<[1], [0], [0], [1], [0, 0, 1, 1], [], []>} : vector<144x24xf32>, vector<24x32xf32>, vector<144x32xf32> -> vector<144x32xf32>
    %259 = vector.extract_strided_slice %258 {offsets = [0, 0], sizes = [24, 32], strides = [1, 1]} : vector<144x32xf32> to vector<24x32xf32>
    %260 = vector.extract_strided_slice %258 {offsets = [24, 0], sizes = [24, 32], strides = [1, 1]} : vector<144x32xf32> to vector<24x32xf32>
    %261 = arith.maximumf %259, %260 : vector<24x32xf32>
    %262 = vector.extract_strided_slice %258 {offsets = [48, 0], sizes = [24, 32], strides = [1, 1]} : vector<144x32xf32> to vector<24x32xf32>
    %263 = arith.maximumf %261, %262 : vector<24x32xf32>
    %264 = vector.extract_strided_slice %258 {offsets = [72, 0], sizes = [24, 32], strides = [1, 1]} : vector<144x32xf32> to vector<24x32xf32>
    %265 = arith.maximumf %263, %264 : vector<24x32xf32>
    %266 = vector.extract_strided_slice %258 {offsets = [96, 0], sizes = [24, 32], strides = [1, 1]} : vector<144x32xf32> to vector<24x32xf32>
    %267 = arith.maximumf %265, %266 : vector<24x32xf32>
    %268 = vector.extract_strided_slice %258 {offsets = [120, 0], sizes = [24, 32], strides = [1, 1]} : vector<144x32xf32> to vector<24x32xf32>
    %269 = arith.maximumf %267, %268 : vector<24x32xf32>
    %270 = vector.extract_strided_slice %250 {offsets = [24, 0], sizes = [24, 32], strides = [1, 1]} : vector<48x32xf32> to vector<24x32xf32>
    %c1_110 = arith.constant 1 : index
    %c0_111 = arith.constant 0 : index
    %c0_112 = arith.constant 0 : index
    %271 = vector.load %arg7[%c1_110, %c0_111, %c0_112] : memref<2x144x24xf32, #tpu.memory_space<vmem>>, vector<1x144x24xf32>
    %272 = vector.shape_cast %271 : vector<1x144x24xf32> to vector<144x24xf32>
    %cst_113 = arith.constant dense<0.000000e+00> : vector<144x32xf32>
    %273 = tpu.matmul %272, %270, %cst_113 {dimension_numbers = #tpu.dot_dimension_numbers<[1], [0], [0], [1], [0, 0, 1, 1], [], []>} : vector<144x24xf32>, vector<24x32xf32>, vector<144x32xf32> -> vector<144x32xf32>
    %274 = vector.extract_strided_slice %273 {offsets = [0, 0], sizes = [24, 32], strides = [1, 1]} : vector<144x32xf32> to vector<24x32xf32>
    %275 = vector.extract_strided_slice %273 {offsets = [24, 0], sizes = [24, 32], strides = [1, 1]} : vector<144x32xf32> to vector<24x32xf32>
    %276 = arith.maximumf %274, %275 : vector<24x32xf32>
    %277 = vector.extract_strided_slice %273 {offsets = [48, 0], sizes = [24, 32], strides = [1, 1]} : vector<144x32xf32> to vector<24x32xf32>
    %278 = arith.maximumf %276, %277 : vector<24x32xf32>
    %279 = vector.extract_strided_slice %273 {offsets = [72, 0], sizes = [24, 32], strides = [1, 1]} : vector<144x32xf32> to vector<24x32xf32>
    %280 = arith.maximumf %278, %279 : vector<24x32xf32>
    %281 = vector.extract_strided_slice %273 {offsets = [96, 0], sizes = [24, 32], strides = [1, 1]} : vector<144x32xf32> to vector<24x32xf32>
    %282 = arith.maximumf %280, %281 : vector<24x32xf32>
    %283 = vector.extract_strided_slice %273 {offsets = [120, 0], sizes = [24, 32], strides = [1, 1]} : vector<144x32xf32> to vector<24x32xf32>
    %284 = arith.maximumf %282, %283 : vector<24x32xf32>
    %285 = tpu.concatenate %269, %284 in 0 : vector<24x32xf32>, vector<24x32xf32> -> vector<48x32xf32>
    %286 = arith.subf %285, %250 : vector<48x32xf32>
    %287 = tpu.concatenate %250, %286 in 1 : vector<48x32xf32>, vector<48x32xf32> -> vector<48x64xf32>
    %cst_114 = arith.constant dense<0.000000e+00> : vector<48x32xf32>
    %288 = tpu.matmul %287, %252, %cst_114 {dimension_numbers = #tpu.dot_dimension_numbers<[1], [0], [0], [1], [0, 0, 1, 1], [], []>} : vector<48x64xf32>, vector<64x32xf32>, vector<48x32xf32> -> vector<48x32xf32>
    %289 = vector.broadcast %254 : vector<1x32xf32> to vector<48x32xf32>
    %290 = arith.addf %288, %289 : vector<48x32xf32>
    %cst_115 = arith.constant 0.000000e+00 : f32
    %291 = vector.broadcast %cst_115 : f32 to vector<48x32xf32>
    %292 = arith.maximumf %290, %291 : vector<48x32xf32>
    %293 = arith.addf %292, %250 : vector<48x32xf32>
    %c1_116 = arith.constant 1 : index
    %c0_117 = arith.constant 0 : index
    %c0_118 = arith.constant 0 : index
    %294 = vector.load %arg3[%c1_116, %c0_117, %c0_118] : memref<2x64x32xf32, #tpu.memory_space<vmem>>, vector<1x64x32xf32>
    %295 = vector.shape_cast %294 : vector<1x64x32xf32> to vector<64x32xf32>
    %c1_119 = arith.constant 1 : index
    %c0_120 = arith.constant 0 : index
    %c0_121 = arith.constant 0 : index
    %296 = vector.load %arg4[%c1_119, %c0_120, %c0_121] : memref<2x1x32xf32, #tpu.memory_space<vmem>>, vector<1x1x32xf32>
    %297 = vector.shape_cast %296 : vector<1x1x32xf32> to vector<1x32xf32>
    %298 = vector.extract_strided_slice %293 {offsets = [0, 0], sizes = [24, 32], strides = [1, 1]} : vector<48x32xf32> to vector<24x32xf32>
    %c0_122 = arith.constant 0 : index
    %c0_123 = arith.constant 0 : index
    %c0_124 = arith.constant 0 : index
    %299 = vector.load %arg7[%c0_122, %c0_123, %c0_124] : memref<2x144x24xf32, #tpu.memory_space<vmem>>, vector<1x144x24xf32>
    %300 = vector.shape_cast %299 : vector<1x144x24xf32> to vector<144x24xf32>
    %cst_125 = arith.constant dense<0.000000e+00> : vector<144x32xf32>
    %301 = tpu.matmul %300, %298, %cst_125 {dimension_numbers = #tpu.dot_dimension_numbers<[1], [0], [0], [1], [0, 0, 1, 1], [], []>} : vector<144x24xf32>, vector<24x32xf32>, vector<144x32xf32> -> vector<144x32xf32>
    %302 = vector.extract_strided_slice %301 {offsets = [0, 0], sizes = [24, 32], strides = [1, 1]} : vector<144x32xf32> to vector<24x32xf32>
    %303 = vector.extract_strided_slice %301 {offsets = [24, 0], sizes = [24, 32], strides = [1, 1]} : vector<144x32xf32> to vector<24x32xf32>
    %304 = arith.maximumf %302, %303 : vector<24x32xf32>
    %305 = vector.extract_strided_slice %301 {offsets = [48, 0], sizes = [24, 32], strides = [1, 1]} : vector<144x32xf32> to vector<24x32xf32>
    %306 = arith.maximumf %304, %305 : vector<24x32xf32>
    %307 = vector.extract_strided_slice %301 {offsets = [72, 0], sizes = [24, 32], strides = [1, 1]} : vector<144x32xf32> to vector<24x32xf32>
    %308 = arith.maximumf %306, %307 : vector<24x32xf32>
    %309 = vector.extract_strided_slice %301 {offsets = [96, 0], sizes = [24, 32], strides = [1, 1]} : vector<144x32xf32> to vector<24x32xf32>
    %310 = arith.maximumf %308, %309 : vector<24x32xf32>
    %311 = vector.extract_strided_slice %301 {offsets = [120, 0], sizes = [24, 32], strides = [1, 1]} : vector<144x32xf32> to vector<24x32xf32>
    %312 = arith.maximumf %310, %311 : vector<24x32xf32>
    %313 = vector.extract_strided_slice %293 {offsets = [24, 0], sizes = [24, 32], strides = [1, 1]} : vector<48x32xf32> to vector<24x32xf32>
    %c1_126 = arith.constant 1 : index
    %c0_127 = arith.constant 0 : index
    %c0_128 = arith.constant 0 : index
    %314 = vector.load %arg7[%c1_126, %c0_127, %c0_128] : memref<2x144x24xf32, #tpu.memory_space<vmem>>, vector<1x144x24xf32>
    %315 = vector.shape_cast %314 : vector<1x144x24xf32> to vector<144x24xf32>
    %cst_129 = arith.constant dense<0.000000e+00> : vector<144x32xf32>
    %316 = tpu.matmul %315, %313, %cst_129 {dimension_numbers = #tpu.dot_dimension_numbers<[1], [0], [0], [1], [0, 0, 1, 1], [], []>} : vector<144x24xf32>, vector<24x32xf32>, vector<144x32xf32> -> vector<144x32xf32>
    %317 = vector.extract_strided_slice %316 {offsets = [0, 0], sizes = [24, 32], strides = [1, 1]} : vector<144x32xf32> to vector<24x32xf32>
    %318 = vector.extract_strided_slice %316 {offsets = [24, 0], sizes = [24, 32], strides = [1, 1]} : vector<144x32xf32> to vector<24x32xf32>
    %319 = arith.maximumf %317, %318 : vector<24x32xf32>
    %320 = vector.extract_strided_slice %316 {offsets = [48, 0], sizes = [24, 32], strides = [1, 1]} : vector<144x32xf32> to vector<24x32xf32>
    %321 = arith.maximumf %319, %320 : vector<24x32xf32>
    %322 = vector.extract_strided_slice %316 {offsets = [72, 0], sizes = [24, 32], strides = [1, 1]} : vector<144x32xf32> to vector<24x32xf32>
    %323 = arith.maximumf %321, %322 : vector<24x32xf32>
    %324 = vector.extract_strided_slice %316 {offsets = [96, 0], sizes = [24, 32], strides = [1, 1]} : vector<144x32xf32> to vector<24x32xf32>
    %325 = arith.maximumf %323, %324 : vector<24x32xf32>
    %326 = vector.extract_strided_slice %316 {offsets = [120, 0], sizes = [24, 32], strides = [1, 1]} : vector<144x32xf32> to vector<24x32xf32>
    %327 = arith.maximumf %325, %326 : vector<24x32xf32>
    %328 = tpu.concatenate %312, %327 in 0 : vector<24x32xf32>, vector<24x32xf32> -> vector<48x32xf32>
    %329 = arith.subf %328, %293 : vector<48x32xf32>
    %330 = tpu.concatenate %293, %329 in 1 : vector<48x32xf32>, vector<48x32xf32> -> vector<48x64xf32>
    %cst_130 = arith.constant dense<0.000000e+00> : vector<48x32xf32>
    %331 = tpu.matmul %330, %295, %cst_130 {dimension_numbers = #tpu.dot_dimension_numbers<[1], [0], [0], [1], [0, 0, 1, 1], [], []>} : vector<48x64xf32>, vector<64x32xf32>, vector<48x32xf32> -> vector<48x32xf32>
    %332 = vector.broadcast %297 : vector<1x32xf32> to vector<48x32xf32>
    %333 = arith.addf %331, %332 : vector<48x32xf32>
    %cst_131 = arith.constant 0.000000e+00 : f32
    %334 = vector.broadcast %cst_131 : f32 to vector<48x32xf32>
    %335 = arith.maximumf %333, %334 : vector<48x32xf32>
    %336 = arith.addf %335, %293 : vector<48x32xf32>
    %337 = vector.extract_strided_slice %336 {offsets = [0, 0], sizes = [24, 32], strides = [1, 1]} : vector<48x32xf32> to vector<24x32xf32>
    %338 = vector.extract_strided_slice %337 {offsets = [0, 0], sizes = [16, 32], strides = [1, 1]} : vector<24x32xf32> to vector<16x32xf32>
    %339 = tpu.transpose %338, [1, 0] : vector<16x32xf32> -> vector<32x16xf32>
    %c0_132 = arith.constant 0 : index
    %c0_133 = arith.constant 0 : index
    %c0_134 = arith.constant 0 : index
    %340 = vector.load %arg5[%c0_132, %c0_133, %c0_134] : memref<2x32x16xf32, #tpu.memory_space<vmem>>, vector<1x32x16xf32>
    %341 = vector.shape_cast %340 : vector<1x32x16xf32> to vector<32x16xf32>
    %342 = vector.shape_cast %339 : vector<32x16xf32> to vector<1x32x16xf32>
    tpu.vector_store %arg5[%c0_132, %c0_133, %c0_134], %342 {strides = array<i32>} : memref<2x32x16xf32, #tpu.memory_space<vmem>>, vector<1x32x16xf32>,
    %343 = vector.extract_strided_slice %337 {offsets = [16, 0], sizes = [8, 32], strides = [1, 1]} : vector<24x32xf32> to vector<8x32xf32>
    %344 = tpu.transpose %343, [1, 0] : vector<8x32xf32> -> vector<32x8xf32>
    %c0_135 = arith.constant 0 : index
    %c0_136 = arith.constant 0 : index
    %c0_137 = arith.constant 0 : index
    %345 = vector.load %arg6[%c0_135, %c0_136, %c0_137] : memref<2x32x8xf32, #tpu.memory_space<vmem>>, vector<1x32x8xf32>
    %346 = vector.shape_cast %345 : vector<1x32x8xf32> to vector<32x8xf32>
    %347 = vector.shape_cast %344 : vector<32x8xf32> to vector<1x32x8xf32>
    tpu.vector_store %arg6[%c0_135, %c0_136, %c0_137], %347 {strides = array<i32>} : memref<2x32x8xf32, #tpu.memory_space<vmem>>, vector<1x32x8xf32>,
    %348 = vector.extract_strided_slice %336 {offsets = [24, 0], sizes = [24, 32], strides = [1, 1]} : vector<48x32xf32> to vector<24x32xf32>
    %349 = vector.extract_strided_slice %348 {offsets = [0, 0], sizes = [16, 32], strides = [1, 1]} : vector<24x32xf32> to vector<16x32xf32>
    %350 = tpu.transpose %349, [1, 0] : vector<16x32xf32> -> vector<32x16xf32>
    %c1_138 = arith.constant 1 : index
    %c0_139 = arith.constant 0 : index
    %c0_140 = arith.constant 0 : index
    %351 = vector.load %arg5[%c1_138, %c0_139, %c0_140] : memref<2x32x16xf32, #tpu.memory_space<vmem>>, vector<1x32x16xf32>
    %352 = vector.shape_cast %351 : vector<1x32x16xf32> to vector<32x16xf32>
    %353 = vector.shape_cast %350 : vector<32x16xf32> to vector<1x32x16xf32>
    tpu.vector_store %arg5[%c1_138, %c0_139, %c0_140], %353 {strides = array<i32>} : memref<2x32x16xf32, #tpu.memory_space<vmem>>, vector<1x32x16xf32>,
    %354 = vector.extract_strided_slice %348 {offsets = [16, 0], sizes = [8, 32], strides = [1, 1]} : vector<24x32xf32> to vector<8x32xf32>
    %355 = tpu.transpose %354, [1, 0] : vector<8x32xf32> -> vector<32x8xf32>
    %c1_141 = arith.constant 1 : index
    %c0_142 = arith.constant 0 : index
    %c0_143 = arith.constant 0 : index
    %356 = vector.load %arg6[%c1_141, %c0_142, %c0_143] : memref<2x32x8xf32, #tpu.memory_space<vmem>>, vector<1x32x8xf32>
    %357 = vector.shape_cast %356 : vector<1x32x8xf32> to vector<32x8xf32>
    %358 = vector.shape_cast %355 : vector<32x8xf32> to vector<1x32x8xf32>
    tpu.vector_store %arg6[%c1_141, %c0_142, %c0_143], %358 {strides = array<i32>} : memref<2x32x8xf32, #tpu.memory_space<vmem>>, vector<1x32x8xf32>,
    return
  }
  func.func @transform_0(%arg0: i32) -> (i32, i32, i32) {
    %c0_i32 = arith.constant 0 : i32
    %c0_i32_0 = arith.constant 0 : i32
    %c0_i32_1 = arith.constant 0 : i32
    return %arg0, %c0_i32, %c0_i32_0 : i32, i32, i32
  }
  func.func @transform_1(%arg0: i32) -> (i32, i32, i32) {
    %c0_i32 = arith.constant 0 : i32
    %c0_i32_0 = arith.constant 0 : i32
    %c0_i32_1 = arith.constant 0 : i32
    return %arg0, %c0_i32, %c0_i32_0 : i32, i32, i32
  }
  func.func @transform_2(%arg0: i32) -> (i32, i32, i32) {
    %c0_i32 = arith.constant 0 : i32
    %c0_i32_0 = arith.constant 0 : i32
    %c0_i32_1 = arith.constant 0 : i32
    %c0_i32_2 = arith.constant 0 : i32
    return %c0_i32, %c0_i32_0, %c0_i32_1 : i32, i32, i32
  }
  func.func @transform_3(%arg0: i32) -> (i32, i32, i32) {
    %c0_i32 = arith.constant 0 : i32
    %c0_i32_0 = arith.constant 0 : i32
    %c0_i32_1 = arith.constant 0 : i32
    %c0_i32_2 = arith.constant 0 : i32
    return %c0_i32, %c0_i32_0, %c0_i32_1 : i32, i32, i32
  }
  func.func @transform_4(%arg0: i32) -> (i32, i32, i32) {
    %c0_i32 = arith.constant 0 : i32
    %c0_i32_0 = arith.constant 0 : i32
    %c0_i32_1 = arith.constant 0 : i32
    return %arg0, %c0_i32, %c0_i32_0 : i32, i32, i32
  }
  func.func @transform_5(%arg0: i32) -> (i32, i32, i32) {
    %c0_i32 = arith.constant 0 : i32
    %c0_i32_0 = arith.constant 0 : i32
    %c0_i32_1 = arith.constant 0 : i32
    return %arg0, %c0_i32, %c0_i32_0 : i32, i32, i32
  }
}

</mosaic_0001>

<bundles_post_ra>
// kernel: tpu_custom_call.1
= control target key start
LH: loop header
LB: loop body
LE: loop exit
PB: predicated region body
PF: predicated region fallthrough
CT: control target
= control target key end

     0   :  { %vm114_vm0 = vcmask 261120   ;;  %v2741_v25 = vmov 0.0   ;;  %vm2742_vm1 = vmmov 0   ;;  %vm133_vm2 = vcmask 269312   ;;  %s2744_s14 = smov 32   ;;  %s3753_s1 = inlined_call_operand.vmem [shape: f32[2,32,8], index: 1, kind: input, shape index: {}]   ;;  %s3754_s0 = inlined_call_operand.vmem [shape: f32[2,32,16], index: 0, kind: input, shape index: {}]   ;;  %s3755_s2 = inlined_call_operand.vmem [shape: f32[2,64,32], index: 2, kind: input, shape index: {}]   ;;  %s3756_s3 = inlined_call_operand.vmem [shape: f32[2,1,32], index: 3, kind: input, shape index: {}]   ;;  %s3757_s4 = inlined_call_operand.vmem [shape: f32[2,32,16], index: 4, kind: output, shape index: {0}]   ;;  %s3758_s5 = inlined_call_operand.vmem [shape: f32[2,32,8], index: 5, kind: output, shape index: {1}]  }
   0x1   :  { %v75_v0 = vld [vmem:[%s3753_s1] sm:$0xff]  ;;  %v76_v2 = vld [vmem:[%s3753_s1 + $0x8] sm:$0xff]  ;;  %v77_v4 = vld [vmem:[%s3753_s1 + $0x10] sm:$0xff]  ;;  %2519 = vmatprep.subr.mxu0 %v2741_v25  ;;  %2534 = vmatprep.subr.mxu1 %v2741_v25  ;;  %v19_v59 = vlaneseq  ;;  %vm2743_vm4 = vmmov 1   ;;  %vm238_vm8 = vcmask 195584  }
   0x2   :  { %v39_v1 = vld [vmem:[%s3754_s0] sm:$0xff]  ;;  %79 = vxpose.xlu0.b32.start [1/4] (short) (narrow) %v75_v0, 8  ;;  %v40_v3 = vld [vmem:[%s3754_s0 + $0x8] sm:$0xff]  ;;  %v41_v5 = vld [vmem:[%s3754_s0 + $0x10] sm:$0xff]  ;;  %2525 = vmatprep.mubr.msk.f32.mxu0 %vm2742_vm1, %v2741_v25 }
   0x3   :  { %43 = vxpose.xlu1.b32.start [1/4] (short) (narrow) %v39_v1, 16  ;;  %v78_v6 = vld [vmem:[%s3753_s1 + $0x18] sm:$0xff]  ;;  %v2264_v8 = vld [vmem:[%s3753_s1 + $0x20] sm:$0xff]  ;;  %v2265_v10 = vld [vmem:[%s3753_s1 + $0x28] sm:$0xff]  ;;  %2540 = vmatprep.mubr.msk.f32.mxu1 %vm2742_vm1, %v2741_v25  ;;  %v24_v60 = vand.u32 127, %v19_v59  ;;  %v20_v61 = vshrl.u32 %v19_v59, 7 }
   0x4   :  { %v42_v7 = vld [vmem:[%s3754_s0 + $0x18] sm:$0xff]  ;;  %v2260_v9 = vld [vmem:[%s3754_s0 + $0x20] sm:$0xff]  ;;  %v2261_v11 = vld [vmem:[%s3754_s0 + $0x28] sm:$0xff] }
   0x5   :  { %v2266_v12 = vld [vmem:[%s3753_s1 + $0x30] sm:$0xff]  ;;  %v2267_v14 = vld [vmem:[%s3753_s1 + $0x38] sm:$0xff]  ;;  %vm29_vm3 = vcmp.lt.s32.totalorder %v24_v60, 16  ;;  %vm36_vm7 = vcmp.eq.s32.totalorder %v20_v61, %v24_v60  ;;  %v21_v63 = vadd.s32 8, %v20_v61 }
   0x6   :  { %80 = vxpose.xlu0.b32.cont [2/4] (short) (narrow) %v76_v2, 8  ;;  %v2262_v13 = vld [vmem:[%s3754_s0 + $0x30] sm:$0xff]  ;;  %v2263_v15 = vld [vmem:[%s3754_s0 + $0x38] sm:$0xff]  ;;  %vm30_vm5 = vmxor %vm2743_vm4, %vm29_vm3 }
   0x7   :  { %44 = vxpose.xlu1.b32.cont [2/4] (short) (narrow) %v40_v3, 16  ;;  %vm2922_vm6 = vmxor %vm30_vm5, %vm2743_vm4  ;;  %vm37_vm9 = vcmp.eq.s32.totalorder %v21_v63, %v24_v60 }
   0x8   :  { %vm2948_vm10 = vmxor %vm29_vm3, %vm2743_vm4 }
   0xa   :  { %81 = vxpose.xlu0.b32.cont [3/4] (short) (narrow) %v77_v4, 8 }
   0xb   :  { %45 = vxpose.xlu1.b32.cont [3/4] (short) (narrow) %v41_v5, 16 }
   0xe   :  { %82 = vxpose.xlu0.b32.end [4/4] (short) (narrow) %v78_v6, 8  ;;  %v22_v6 = vadd.s32 16, %v20_v61 }
   0xf   :  { %46 = vxpose.xlu1.b32.end [4/4] (short) (narrow) %v42_v7, 16 }
  0x10   :  { %vm38_vm11 = vcmp.eq.s32.totalorder %v22_v6, %v24_v60 }
  0x12   :  { %512 = vxpose.xlu0.b32.start [1/4] (short) (narrow) %v2264_v8, 8 }
  0x13   :  { %475 = vxpose.xlu1.b32.start [1/4] (short) (narrow) %v2260_v9, 16 }
  0x16   :  { %513 = vxpose.xlu0.b32.cont [2/4] (short) (narrow) %v2265_v10, 8 }
  0x17   :  { %476 = vxpose.xlu1.b32.cont [2/4] (short) (narrow) %v2261_v11, 16 }
  0x1a   :  { %514 = vxpose.xlu0.b32.cont [3/4] (short) (narrow) %v2266_v12, 8 }
  0x1b   :  { %477 = vxpose.xlu1.b32.cont [3/4] (short) (narrow) %v2262_v13, 16 }
  0x1e   :  { %515 = vxpose.xlu0.b32.end [4/4] (short) (narrow) %v2267_v14, 8 }
  0x1f   :  { %478 = vxpose.xlu1.b32.end [4/4] (short) (narrow) %v2263_v15, 16 }
  0x7e   :  { %v2823_v16 = vpop.trf.xlu0 }
  0x7f   :  { %v2825_v17 = vpop.trf.xlu1  ;;  %v113_v18 = vmul.f32 %v2823_v16, %v2823_v16  ;;  %v126_v46 = vmul.f32 -2.0, %v2823_v16 }
  0x80   :  { %v111_v23 = vmul.f32 %v2825_v17, %v2825_v17  ;;  %v124_v40 = vmul.f32 -2.0, %v2825_v17 }
  0x81   :  { %v121_v19 = vsel %vm114_vm0, %v113_v18, 0.0  ;;  %v129_v49 = vsel %vm114_vm0, %v126_v46, 1.0 }
  0x82   :  { %122 = vadd.xlane.f32.xlu0 %v121_v19  ;;  %v115_v24 = vsel %vm114_vm0, %v111_v23, 0.0  ;;  %v127_v42 = vsel %vm114_vm0, %v124_v40, 1.0 }
  0x83   :  { %v2830_v20 = vpop.trf.xlu1 }
  0x84   :  { %v112_v21 = vmul.f32 %v2830_v20, %v2830_v20  ;;  %v125_v43 = vmul.f32 -2.0, %v2830_v20 }
  0x86   :  { %v118_v22 = vsel %vm114_vm0, %v112_v21, 0.0  ;;  %v128_v45 = vsel %vm114_vm0, %v125_v43, 1.0 }
  0x87   :  { %119 = vadd.xlane.f32.xlu1 %v118_v22 }
  0x8b   :  { %116 = vadd.xlane.f32.xlu1 %v115_v24 }
  0x8e   :  { %v2840_v26 = vpop.trf.xlu0 }
  0x8f   :  { %v2842_v27 = vpop.trf.xlu1  ;;  %v546_v28 = vmul.f32 %v2840_v26, %v2840_v26  ;;  %v558_v57 = vmul.f32 -2.0, %v2840_v26 }
  0x90   :  { %v544_v30 = vmul.f32 %v2842_v27, %v2842_v27  ;;  %v556_v52 = vmul.f32 -2.0, %v2842_v27 }
  0x91   :  { %v553_v29 = vsel %vm114_vm0, %v546_v28, 0.0  ;;  %v561_v58 = vsel %vm114_vm0, %v558_v57, 1.0 }
  0x92   :  { %554 = vadd.xlane.f32.xlu1 %v553_v29  ;;  %v547_v33 = vsel %vm114_vm0, %v544_v30, 0.0  ;;  %v559_v54 = vsel %vm114_vm0, %v556_v52, 1.0 }
  0x93   :  { %v2849_v31 = vpop.trf.xlu1 }
  0x94   :  { %v545_v32 = vmul.f32 %v2849_v31, %v2849_v31  ;;  %v557_v55 = vmul.f32 -2.0, %v2849_v31 }
  0x96   :  { %v550_v34 = vsel %vm114_vm0, %v545_v32, 0.0  ;;  %548 = vadd.xlane.f32.xlu1 %v547_v33  ;;  %v560_v56 = vsel %vm114_vm0, %v557_v55, 1.0 }
  0x97   :  { %551 = vadd.xlane.f32.xlu0 %v550_v34 }
 0x10b   :  { %v123_v35 = vpop.xlane.xlu0 %122 }
 0x10c   :  { %v132_v36 = vsel %vm114_vm0, %v2823_v16, %v123_v35 }
 0x10d   :  { %2520 = vmatpush3.xpose.msk.msra.mxu0 %vm133_vm2, %v132_v36 }
 0x10e   :  { %2521 = vmatprep.subr.mxu0 %v2741_v25 }
 0x110   :  { %v120_v37 = vpop.xlane.xlu1 %119 }
 0x111   :  { %v131_v38 = vsel %vm114_vm0, %v2830_v20, %v120_v37 }
 0x112   :  { %2522 = vmatpush3.xpose.msk.msra.mxu0 %vm133_vm2, %v131_v38 }
 0x113   :  { %2523 = vmatprep.subr.mxu0 %v2741_v25 }
 0x114   :  { %v117_v39 = vpop.xlane.xlu1 %116 }
 0x115   :  { %v130_v41 = vsel %vm114_vm0, %v2825_v17, %v117_v39 }
 0x116   :  { %2524 = vmatpush3.xpose.msk.msra.mxu0 %vm133_vm2, %v130_v41 }
 0x117   :  { %2549 = vmatprep.subr.mxu0 %v2823_v16 }
 0x119   :  { %2526 = vmatmul.mubr.msk.f32.vlgmr.msra.gmra.mxu0 %vm133_vm2, %v127_v42 }
 0x11a   :  { %2550 = vmatpush3.msra.mxu0 %v2823_v16  ;;  %2528 = vmatprep.mubr.msk.f32.mxu0 %vm2742_vm1, %v2741_v25 }
 0x11b   :  { %2551 = vmatprep.subr.mxu0 %v2830_v20  ;;  %v555_v44 = vpop.xlane.xlu1 %554 }
 0x11c   :  { %2552 = vmatpush3.msra.mxu0 %v2830_v20  ;;  %v564_v47 = vsel %vm114_vm0, %v2840_v26, %v555_v44 }
 0x11d   :  { %2529 = vmatmul.mubr.msk.f32.gmra.mxu0 %vm133_vm2, %v128_v45  ;;  %2553 = vmatprep.subr.mxu0 %v2825_v17  ;;  %v2998_v45 = vcvt.s32.f32 %v24_v60 }
 0x11e   :  { %2535 = vmatpush3.xpose.msk.msra.mxu1 %vm133_vm2, %v564_v47  ;;  %2554 = vmatpush3.msra.mxu0 %v2825_v17 }
 0x11f   :  { %2531 = vmatprep.mubr.msk.f32.mxu0 %vm2742_vm1, %v2741_v25  ;;  %2536 = vmatprep.subr.mxu1 %v2741_v25  ;;  %v549_v51 = vpop.xlane.xlu1 %548 }
 0x120   :  { %v552_v48 = vpop.xlane.xlu0 %551  ;;  %v562_v53 = vsel %vm114_vm0, %v2842_v27, %v549_v51 }
 0x121   :  { %v563_v50 = vsel %vm114_vm0, %v2849_v31, %v552_v48  ;;  %2532 = vmatmul.mubr.msk.f32.gmra.mxu0 %vm133_vm2, %v129_v49 }
 0x122   :  { %2537 = vmatpush3.xpose.msk.msra.mxu1 %vm133_vm2, %v563_v50 }
 0x123   :  { %2538 = vmatprep.subr.mxu1 %v2741_v25 }
 0x126   :  { %2539 = vmatpush3.xpose.msk.msra.mxu1 %vm133_vm2, %v562_v53 }
 0x127   :  { %2582 = vmatprep.subr.mxu1 %v2840_v26 }
 0x129   :  { %2541 = vmatmul.mubr.msk.f32.vlgmr.msra.gmra.mxu1 %vm133_vm2, %v559_v54 }
 0x12a   :  { %2583 = vmatpush3.msra.mxu1 %v2840_v26  ;;  %2543 = vmatprep.mubr.msk.f32.mxu1 %vm2742_vm1, %v2741_v25 }
 0x12b   :  { %2584 = vmatprep.subr.mxu1 %v2849_v31 }
 0x12c   :  { %2585 = vmatpush3.msra.mxu1 %v2849_v31 }
 0x12d   :  { %2544 = vmatmul.mubr.msk.f32.gmra.mxu1 %vm133_vm2, %v560_v56  ;;  %2586 = vmatprep.subr.mxu1 %v2842_v27 }
 0x12e   :  { %2587 = vmatpush3.msra.mxu1 %v2842_v27  ;;  %2546 = vmatprep.mubr.msk.f32.mxu1 %vm2742_vm1, %v2741_v25 }
 0x131   :  { %2547 = vmatmul.mubr.msk.f32.gmra.mxu1 %vm133_vm2, %v561_v58 }
 0x1d9   :  { %v218_v0 = vpop.f32.mrf.mxu0 }
 0x1da   :  { %v232_v1 = vsel %vm2922_vm6, %v218_v0, 1e+30  ;;  %v2930_v2 = vsel %vm2922_vm6, 1e+30, %v218_v0 }
 0x1db   :  { %v2527_v3 = vpop.f32.mrf.mxu0  ;;  %v2933_v4 = vsel %vm36_vm7, -1e+30, %v232_v1 }
 0x1dc   :  { %v239_v5 = vsel %vm238_vm8, %v2933_v4, inf }
 0x1dd   :  { %240 = vmin.xlane.f32.xlu0 %v239_v5  ;;  %v223_v7 = vpop.f32.mrf.mxu0 }
 0x1de   :  { %v233_v8 = vsel %vm2922_vm6, %v223_v7, 1e+30  ;;  %v2941_v9 = vsel %vm2922_vm6, 1e+30, %v223_v7 }
 0x1df   :  { %v2530_v10 = vpop.f32.mrf.mxu0  ;;  %v2944_v11 = vsel %vm37_vm9, -1e+30, %v233_v8 }
 0x1e0   :  { %v242_v13 = vsel %vm238_vm8, %v2944_v11, inf }
 0x1e1   :  { %243 = vmin.xlane.f32.xlu1 %v242_v13  ;;  %v228_v14 = vpop.f32.mrf.mxu0 }
 0x1e2   :  { %v234_v15 = vsel %vm2948_vm10, %v228_v14, 1e+30  ;;  %v2958_v18 = vsel %vm2948_vm10, 1e+30, %v228_v14 }
 0x1e3   :  { %v2533_v19 = vpop.f32.mrf.mxu0  ;;  %v2961_v21 = vsel %vm38_vm11, -1e+30, %v234_v15 }
 0x1e4   :  { %v245_v22 = vsel %vm238_vm8, %v2961_v21, inf }
 0x1e5   :  { %246 = vmin.xlane.f32.xlu0 %v245_v22 }
 0x1e9   :  { %v649_v23 = vpop.f32.mrf.mxu1 }
 0x1ea   :  { %v663_v24 = vsel %vm2922_vm6, %v649_v23, 1e+30  ;;  %v2969_v28 = vsel %vm2922_vm6, 1e+30, %v649_v23 }
 0x1eb   :  { %v2542_v29 = vpop.f32.mrf.mxu1  ;;  %v2972_v30 = vsel %vm36_vm7, -1e+30, %v663_v24 }
 0x1ec   :  { %v669_v32 = vsel %vm238_vm8, %v2972_v30, inf }
 0x1ed   :  { %670 = vmin.xlane.f32.xlu1 %v669_v32  ;;  %v654_v33 = vpop.f32.mrf.mxu1 }
 0x1ee   :  { %v664_v34 = vsel %vm2922_vm6, %v654_v33, 1e+30  ;;  %v2980_v35 = vsel %vm2922_vm6, 1e+30, %v654_v33 }
 0x1ef   :  { %v2545_v36 = vpop.f32.mrf.mxu1  ;;  %v2983_v37 = vsel %vm37_vm9, -1e+30, %v664_v34 }
 0x1f0   :  { %v672_v38 = vsel %vm238_vm8, %v2983_v37, inf }
 0x1f1   :  { %673 = vmin.xlane.f32.xlu0 %v672_v38  ;;  %v659_v39 = vpop.f32.mrf.mxu1 }
 0x1f2   :  { %v665_v40 = vsel %vm2948_vm10, %v659_v39, 1e+30  ;;  %v2991_v41 = vsel %vm2948_vm10, 1e+30, %v659_v39 }
 0x1f3   :  { %v2548_v42 = vpop.f32.mrf.mxu1  ;;  %v2994_v43 = vsel %vm38_vm11, -1e+30, %v665_v40 }
 0x1f4   :  { %v675_v44 = vsel %vm238_vm8, %v2994_v43, inf }
 0x1f5   :  { %676 = vmin.xlane.f32.xlu1 %v675_v44 }
 0x266   :  { %v241_v46 = vpop.xlane.xlu0 %240 }
 0x267   :  { %vm248_vm12 = vcmp.le.f32.partialorder %v2933_v4, %v241_v46 }
 0x268   :  { %v251_v47 = vsel %vm248_vm12, %v2998_v45, 24.0 }
 0x269   :  { %v254_v48 = vsel %vm238_vm8, %v251_v47, inf }
 0x26a   :  { %255 = vmin.xlane.f32.xlu0 %v254_v48  ;;  %v244_v49 = vpop.xlane.xlu1 %243 }
 0x26b   :  { %vm249_vm13 = vcmp.le.f32.partialorder %v2944_v11, %v244_v49 }
 0x26c   :  { %v252_v50 = vsel %vm249_vm13, %v2998_v45, 24.0 }
 0x26d   :  { %v257_v51 = vsel %vm238_vm8, %v252_v50, inf }
 0x26e   :  { %v247_v52 = vpop.xlane.xlu0 %246  ;;  %258 = vmin.xlane.f32.xlu1 %v257_v51 }
 0x26f   :  { %vm250_vm14 = vcmp.le.f32.partialorder %v2961_v21, %v247_v52 }
 0x270   :  { %v253_v53 = vsel %vm250_vm14, %v2998_v45, 24.0 }
 0x271   :  { %v260_v54 = vsel %vm238_vm8, %v253_v53, inf }
 0x272   :  { %261 = vmin.xlane.f32.xlu0 %v260_v54 }
 0x276   :  { %v671_v55 = vpop.xlane.xlu1 %670 }
 0x277   :  { %vm678_vm15 = vcmp.le.f32.partialorder %v2972_v30, %v671_v55 }
 0x278   :  { %v681_v56 = vsel %vm678_vm15, %v2998_v45, 24.0 }
 0x279   :  { %v684_v57 = vsel %vm238_vm8, %v681_v56, inf }
 0x27a   :  { %v674_v58 = vpop.xlane.xlu0 %673  ;;  %685 = vmin.xlane.f32.xlu1 %v684_v57 }
 0x27b   :  { %vm679_vm1 = vcmp.le.f32.partialorder %v2983_v37, %v674_v58 }
 0x27c   :  { %v682_v59 = vsel %vm679_vm1, %v2998_v45, 24.0 }
 0x27d   :  { %v687_v60 = vsel %vm238_vm8, %v682_v59, inf }
 0x27e   :  { %688 = vmin.xlane.f32.xlu0 %v687_v60  ;;  %v677_v61 = vpop.xlane.xlu1 %676 }
 0x27f   :  { %vm680_vm2 = vcmp.le.f32.partialorder %v2994_v43, %v677_v61 }
 0x280   :  { %v683_v62 = vsel %vm680_vm2, %v2998_v45, 24.0 }
 0x281   :  { %v690_v63 = vsel %vm238_vm8, %v683_v62, inf }
 0x282   :  { %691 = vmin.xlane.f32.xlu1 %v690_v63 }
 0x2f3   :  { %v256_v0 = vpop.xlane.xlu0 %255 }
 0x2f4   :  { %vm263_vm3 = vcmp.eq.f32.partialorder %v2998_v45, %v256_v0 }
 0x2f5   :  { %v2242_v1 = vsel %vm263_vm3, 1.0, %v2741_v25  ;;  %v3021_v3 = vsel %vm263_vm3, 1e+30, %v2933_v4 }
 0x2f6   :  { %272 = vst.msk [vmem:[#allocation2] sm:$0xff] %vm238_vm8, %v2242_v1  ;;  %v278_v5 = vsel %vm238_vm8, %v3021_v3, inf }
 0x2f7   :  { %279 = vmin.xlane.f32.xlu0 %v278_v5  ;;  %v259_v6 = vpop.xlane.xlu1 %258 }
 0x2f8   :  { %vm264_vm4 = vcmp.eq.f32.partialorder %v2998_v45, %v259_v6 }
 0x2f9   :  { %v2243_v7 = vsel %vm264_vm4, 1.0, %v2741_v25  ;;  %v3029_v8 = vsel %vm264_vm4, 1e+30, %v2944_v11 }
 0x2fa   :  { %273 = vst.msk [vmem:[#allocation2 + $0x8] sm:$0xff] %vm238_vm8, %v2243_v7  ;;  %v281_v4 = vsel %vm238_vm8, %v3029_v8, inf }
 0x2fb   :  { %v262_v10 = vpop.xlane.xlu0 %261  ;;  %282 = vmin.xlane.f32.xlu1 %v281_v4 }
 0x2fc   :  { %vm265_vm5 = vcmp.eq.f32.partialorder %v2998_v45, %v262_v10 }
 0x2fd   :  { %v2244_v12 = vsel %vm265_vm5, 1.0, %v2741_v25  ;;  %v3037_v13 = vsel %vm265_vm5, 1e+30, %v2961_v21  ;;  %v3039_v14 = vld [vmem:[#allocation2] sm:$0xff] }
 0x2fe   :  { %274 = vst.msk [vmem:[#allocation2 + $0x10] sm:$0xff] %vm238_vm8, %v2244_v12  ;;  %2555 = vmatprep.mubr.msk.f32.mxu0 %vm238_vm8, %v3039_v14  ;;  %v284_v11 = vsel %vm238_vm8, %v3037_v13, inf }
 0x2ff   :  { %285 = vmin.xlane.f32.xlu0 %v284_v11 }
 0x301   :  { %v911_v15 = vld [vmem:[#allocation2 + $0x8] sm:$0xff] }
 0x302   :  { %2556 = vmatmul.mubr.msk.f32.vlgmr.msra.gmra.mxu0 %vm238_vm8, %v911_v15 }
 0x303   :  { %v686_v19 = vpop.xlane.xlu1 %685 }
 0x304   :  { %vm693_vm6 = vcmp.eq.f32.partialorder %v2998_v45, %v686_v19  ;;  %v395_v19 = vsel %vm238_vm8, %v2930_v2, inf }
 0x305   :  { %v2274_v21 = vsel %vm693_vm6, 1.0, %v2741_v25  ;;  %v3050_v22 = vsel %vm693_vm6, 1e+30, %v2972_v30  ;;  %v912_v23 = vld [vmem:[#allocation2 + $0x10] sm:$0xff] }
 0x306   :  { %703 = vst.msk [vmem:[#allocation2 + $0x90] sm:$0xff] %vm238_vm8, %v2274_v21  ;;  %2558 = vmatprep.mubr.msk.f32.mxu0 %vm238_vm8, %v912_v23  ;;  %v709_v24 = vsel %vm238_vm8, %v3050_v22, inf }
 0x307   :  { %v689_v29 = vpop.xlane.xlu0 %688  ;;  %710 = vmin.xlane.f32.xlu1 %v709_v24 }
 0x308   :  { %vm694_vm7 = vcmp.eq.f32.partialorder %v2998_v45, %v689_v29 }
 0x309   :  { %v2275_v32 = vsel %vm694_vm7, 1.0, %v2741_v25  ;;  %v3059_v33 = vsel %vm694_vm7, 1e+30, %v2983_v37 }
 0x30a   :  { %704 = vst.msk [vmem:[#allocation2 + $0x98] sm:$0xff] %vm238_vm8, %v2275_v32  ;;  %v712_v30 = vsel %vm238_vm8, %v3059_v33, inf }
 0x30b   :  { %713 = vmin.xlane.f32.xlu0 %v712_v30  ;;  %v692_v34 = vpop.xlane.xlu1 %691 }
 0x30c   :  { %vm695_vm9 = vcmp.eq.f32.partialorder %v2998_v45, %v692_v34 }
 0x30d   :  { %v2276_v36 = vsel %vm695_vm9, 1.0, %v2741_v25  ;;  %v3067_v38 = vsel %vm695_vm9, 1e+30, %v2994_v43  ;;  %v1152_v39 = vld [vmem:[#allocation2 + $0x90] sm:$0xff] }
 0x30e   :  { %705 = vst.msk [vmem:[#allocation2 + $0xa0] sm:$0xff] %vm238_vm8, %v2276_v36  ;;  %2588 = vmatprep.mubr.msk.f32.mxu1 %vm238_vm8, %v1152_v39  ;;  %v715_v37 = vsel %vm238_vm8, %v3067_v38, inf }
 0x30f   :  { %716 = vmin.xlane.f32.xlu1 %v715_v37 }
 0x311   :  { %v1153_v40 = vld [vmem:[#allocation2 + $0x98] sm:$0xff] }
 0x312   :  { %2589 = vmatmul.mubr.msk.f32.vlgmr.msra.gmra.mxu1 %vm238_vm8, %v1153_v40 }
 0x315   :  { %v1154_v42 = vld [vmem:[#allocation2 + $0xa0] sm:$0xff] }
 0x316   :  { %2591 = vmatprep.mubr.msk.f32.mxu1 %vm238_vm8, %v1154_v42 }
 0x380   :  { %v280_v44 = vpop.xlane.xlu0 %279 }
 0x381   :  { %vm287_vm10 = vcmp.le.f32.partialorder %v3021_v3, %v280_v44 }
 0x382   :  { %v290_v43 = vsel %vm287_vm10, %v2998_v45, 24.0 }
 0x383   :  { %v293_v46 = vsel %vm238_vm8, %v290_v43, inf  ;;  %v401_v43 = vsel %vm238_vm8, %v2958_v18, inf }
 0x384   :  { %294 = vmin.xlane.f32.xlu0 %v293_v46  ;;  %v283_v47 = vpop.xlane.xlu1 %282 }
 0x385   :  { %vm288_vm11 = vcmp.le.f32.partialorder %v3029_v8, %v283_v47  ;;  %v832_v47 = vsel %vm238_vm8, %v2991_v41, inf }
 0x386   :  { %v291_v48 = vsel %vm288_vm11, %v2998_v45, 24.0 }
 0x387   :  { %v296_v49 = vsel %vm238_vm8, %v291_v48, inf  ;;  %v829_v48 = vsel %vm238_vm8, %v2980_v35, inf }
 0x388   :  { %v286_v50 = vpop.xlane.xlu0 %285  ;;  %297 = vmin.xlane.f32.xlu1 %v296_v49 }
 0x389   :  { %vm289_vm12 = vcmp.le.f32.partialorder %v3037_v13, %v286_v50 }
 0x38a   :  { %v292_v51 = vsel %vm289_vm12, %v2998_v45, 24.0 }
 0x38b   :  { %v299_v52 = vsel %vm238_vm8, %v292_v51, inf }
 0x38c   :  { %300 = vmin.xlane.f32.xlu0 %v299_v52 }
 0x390   :  { %v711_v53 = vpop.xlane.xlu1 %710 }
 0x391   :  { %vm718_vm13 = vcmp.le.f32.partialorder %v3050_v22, %v711_v53 }
 0x392   :  { %v721_v54 = vsel %vm718_vm13, %v2998_v45, 24.0 }
 0x393   :  { %v724_v55 = vsel %vm238_vm8, %v721_v54, inf }
 0x394   :  { %v714_v56 = vpop.xlane.xlu0 %713  ;;  %725 = vmin.xlane.f32.xlu1 %v724_v55 }
 0x395   :  { %vm719_vm14 = vcmp.le.f32.partialorder %v3059_v33, %v714_v56 }
 0x396   :  { %v722_v57 = vsel %vm719_vm14, %v2998_v45, 24.0 }
 0x397   :  { %v727_v58 = vsel %vm238_vm8, %v722_v57, inf }
 0x398   :  { %728 = vmin.xlane.f32.xlu0 %v727_v58  ;;  %v717_v59 = vpop.xlane.xlu1 %716 }
 0x399   :  { %vm720_vm15 = vcmp.le.f32.partialorder %v3067_v38, %v717_v59 }
 0x39a   :  { %v723_v60 = vsel %vm720_vm15, %v2998_v45, 24.0 }
 0x39b   :  { %v730_v61 = vsel %vm238_vm8, %v723_v60, inf }
 0x39c   :  { %731 = vmin.xlane.f32.xlu1 %v730_v61 }
 0x40d   :  { %v295_v62 = vpop.xlane.xlu0 %294 }
 0x40e   :  { %vm302_vm1 = vcmp.eq.f32.partialorder %v2998_v45, %v295_v62 }
 0x40f   :  { %v2245_v63 = vsel %vm302_vm1, 1.0, %v2741_v25  ;;  %v3096_v0 = vsel %vm302_vm1, 1e+30, %v3021_v3 }
 0x410   :  { %311 = vst.msk [vmem:[#allocation2 + $0x18] sm:$0xff] %vm238_vm8, %v2245_v63  ;;  %v317_v1 = vsel %vm238_vm8, %v3096_v0, inf }
 0x411   :  { %318 = vmin.xlane.f32.xlu0 %v317_v1  ;;  %v298_v5 = vpop.xlane.xlu1 %297 }
 0x412   :  { %vm303_vm2 = vcmp.eq.f32.partialorder %v2998_v45, %v298_v5 }
 0x413   :  { %v2246_v6 = vsel %vm303_vm2, 1.0, %v2741_v25  ;;  %v3104_v7 = vsel %vm303_vm2, 1e+30, %v3029_v8 }
 0x414   :  { %312 = vst.msk [vmem:[#allocation2 + $0x20] sm:$0xff] %vm238_vm8, %v2246_v6  ;;  %v320_v3 = vsel %vm238_vm8, %v3104_v7, inf }
 0x415   :  { %v301_v4 = vpop.xlane.xlu0 %300  ;;  %321 = vmin.xlane.f32.xlu1 %v320_v3 }
 0x416   :  { %vm304_vm3 = vcmp.eq.f32.partialorder %v2998_v45, %v301_v4 }
 0x417   :  { %v2247_v10 = vsel %vm304_vm3, 1.0, %v2741_v25  ;;  %v3112_v12 = vsel %vm304_vm3, 1e+30, %v3037_v13  ;;  %v913_v11 = vld [vmem:[#allocation2 + $0x18] sm:$0xff] }
 0x418   :  { %313 = vst.msk [vmem:[#allocation2 + $0x28] sm:$0xff] %vm238_vm8, %v2247_v10  ;;  %2559 = vmatmul.mubr.msk.f32.gmra.mxu0 %vm238_vm8, %v913_v11  ;;  %v323_v8 = vsel %vm238_vm8, %v3112_v12, inf }
 0x419   :  { %324 = vmin.xlane.f32.xlu0 %v323_v8 }
 0x41b   :  { %v3118_v15 = vld [vmem:[#allocation2 + $0x20] sm:$0xff] }
 0x41c   :  { %2561 = vmatprep.mubr.msk.f32.mxu0 %vm238_vm8, %v3118_v15 }
 0x41d   :  { %396 = vmin.xlane.f32.xlu0 %v395_v19  ;;  %v726_v13 = vpop.xlane.xlu1 %725 }
 0x41e   :  { %vm733_vm4 = vcmp.eq.f32.partialorder %v2998_v45, %v726_v13 }
 0x41f   :  { %v2277_v21 = vsel %vm733_vm4, 1.0, %v2741_v25  ;;  %v3127_v23 = vsel %vm733_vm4, 1e+30, %v3050_v22  ;;  %v3129_v24 = vld [vmem:[#allocation2 + $0x28] sm:$0xff] }
 0x420   :  { %742 = vst.msk [vmem:[#allocation2 + $0xa8] sm:$0xff] %vm238_vm8, %v2277_v21  ;;  %2562 = vmatmul.mubr.msk.f32.gmra.mxu0 %vm238_vm8, %v3129_v24  ;;  %v748_v29 = vsel %vm238_vm8, %v3127_v23, inf }
 0x421   :  { %v729_v32 = vpop.xlane.xlu0 %728  ;;  %749 = vmin.xlane.f32.xlu1 %v748_v29 }
 0x422   :  { %vm734_vm5 = vcmp.eq.f32.partialorder %v2998_v45, %v729_v32 }
 0x423   :  { %v2278_v30 = vsel %vm734_vm5, 1.0, %v2741_v25  ;;  %v3139_v34 = vsel %vm734_vm5, 1e+30, %v3059_v33  ;;  %v398_v33 = vsel %vm238_vm8, %v2941_v9, inf }
 0x424   :  { %743 = vst.msk [vmem:[#allocation2 + $0xb0] sm:$0xff] %vm238_vm8, %v2278_v30  ;;  %v751_v22 = vsel %vm238_vm8, %v3139_v34, inf }
 0x425   :  { %752 = vmin.xlane.f32.xlu1 %v751_v22  ;;  %v732_v36 = vpop.xlane.xlu1 %731 }
 0x426   :  { %vm735_vm6 = vcmp.eq.f32.partialorder %v2998_v45, %v732_v36 }
 0x427   :  { %v2279_v39 = vsel %vm735_vm6, 1.0, %v2741_v25  ;;  %v3147_v37 = vsel %vm735_vm6, 1e+30, %v3067_v38  ;;  %v3149_v40 = vld [vmem:[#allocation2 + $0xa8] sm:$0xff]  ;;  %v826_v38 = vsel %vm238_vm8, %v2969_v28, inf }
 0x428   :  { %744 = vst.msk [vmem:[#allocation2 + $0xb8] sm:$0xff] %vm238_vm8, %v2279_v39  ;;  %2592 = vmatmul.mubr.msk.f32.gmra.mxu1 %vm238_vm8, %v3149_v40  ;;  %v754_v42 = vsel %vm238_vm8, %v3147_v37, inf }
 0x429   :  { %399 = vmin.xlane.f32.xlu1 %v398_v33  ;;  %755 = vmin.xlane.f32.xlu0 %v754_v42 }
 0x42b   :  { %v3158_v44 = vld [vmem:[#allocation2 + $0xb0] sm:$0xff] }
 0x42c   :  { %2594 = vmatprep.mubr.msk.f32.mxu1 %vm238_vm8, %v3158_v44 }
 0x42d   :  { %827 = vmin.xlane.f32.xlu1 %v826_v38  ;;  %402 = vmin.xlane.f32.xlu0 %v401_v43 }
 0x42f   :  { %v3166_v46 = vld [vmem:[#allocation2 + $0xb8] sm:$0xff] }
 0x430   :  { %2595 = vmatmul.mubr.msk.f32.gmra.mxu1 %vm238_vm8, %v3166_v46 }
 0x431   :  { %833 = vmin.xlane.f32.xlu1 %v832_v47  ;;  %830 = vmin.xlane.f32.xlu0 %v829_v48 }
 0x49a   :  { %v319_v49 = vpop.xlane.xlu0 %318 }
 0x49b   :  { %vm326_vm7 = vcmp.le.f32.partialorder %v3096_v0, %v319_v49 }
 0x49c   :  { %v329_v50 = vsel %vm326_vm7, %v2998_v45, 24.0 }
 0x49d   :  { %v332_v51 = vsel %vm238_vm8, %v329_v50, inf }
 0x49e   :  { %333 = vmin.xlane.f32.xlu0 %v332_v51  ;;  %v322_v52 = vpop.xlane.xlu1 %321 }
 0x49f   :  { %vm327_vm9 = vcmp.le.f32.partialorder %v3104_v7, %v322_v52 }
 0x4a0   :  { %v330_v53 = vsel %vm327_vm9, %v2998_v45, 24.0 }
 0x4a1   :  { %v335_v54 = vsel %vm238_vm8, %v330_v53, inf }
 0x4a2   :  { %v325_v55 = vpop.xlane.xlu0 %324  ;;  %336 = vmin.xlane.f32.xlu1 %v335_v54 }
 0x4a3   :  { %vm328_vm10 = vcmp.le.f32.partialorder %v3112_v12, %v325_v55 }
 0x4a4   :  { %v331_v56 = vsel %vm328_vm10, %v2998_v45, 24.0 }
 0x4a5   :  { %v338_v57 = vsel %vm238_vm8, %v331_v56, inf }
 0x4a6   :  { %v397_v58 = vpop.xlane.xlu0 %396  ;;  %339 = vmin.xlane.f32.xlu0 %v338_v57 }
 0x4a7   :  { %vm404_vm11 = vcmp.le.f32.partialorder %v2930_v2, %v397_v58 }
 0x4a8   :  { %v407_v59 = vsel %vm404_vm11, %v2998_v45, 24.0 }
 0x4a9   :  { %v410_v60 = vsel %vm238_vm8, %v407_v59, inf }
 0x4aa   :  { %411 = vmin.xlane.f32.xlu0 %v410_v60  ;;  %v750_v61 = vpop.xlane.xlu1 %749 }
 0x4ab   :  { %vm757_vm12 = vcmp.le.f32.partialorder %v3127_v23, %v750_v61 }
 0x4ac   :  { %v760_v62 = vsel %vm757_vm12, %v2998_v45, 24.0 }
 0x4ad   :  { %v763_v63 = vsel %vm238_vm8, %v760_v62, inf }
 0x4ae   :  { %764 = vmin.xlane.f32.xlu1 %v763_v63  ;;  %v753_v1 = vpop.xlane.xlu1 %752 }
 0x4af   :  { %vm758_vm13 = vcmp.le.f32.partialorder %v3139_v34, %v753_v1 }
 0x4b0   :  { %v761_v5 = vsel %vm758_vm13, %v2998_v45, 24.0 }
 0x4b1   :  { %v766_v6 = vsel %vm238_vm8, %v761_v5, inf }
 0x4b2   :  { %v756_v3 = vpop.xlane.xlu0 %755  ;;  %767 = vmin.xlane.f32.xlu1 %v766_v6  ;;  %v400_v4 = vpop.xlane.xlu1 %399 }
 0x4b3   :  { %vm759_vm14 = vcmp.le.f32.partialorder %v3147_v37, %v756_v3  ;;  %vm405_vm15 = vcmp.le.f32.partialorder %v2941_v9, %v400_v4 }
 0x4b4   :  { %v762_v10 = vsel %vm759_vm14, %v2998_v45, 24.0  ;;  %v408_v11 = vsel %vm405_vm15, %v2998_v45, 24.0 }
 0x4b5   :  { %v769_v8 = vsel %vm238_vm8, %v762_v10, inf  ;;  %v413_v19 = vsel %vm238_vm8, %v408_v11, inf }
 0x4b6   :  { %770 = vmin.xlane.f32.xlu0 %v769_v8  ;;  %v403_v13 = vpop.xlane.xlu0 %402  ;;  %414 = vmin.xlane.f32.xlu1 %v413_v19  ;;  %v828_v21 = vpop.xlane.xlu1 %827 }
 0x4b7   :  { %vm406_vm1 = vcmp.le.f32.partialorder %v2958_v18, %v403_v13  ;;  %vm835_vm2 = vcmp.le.f32.partialorder %v2969_v28, %v828_v21 }
 0x4b8   :  { %v409_v29 = vsel %vm406_vm1, %v2998_v45, 24.0  ;;  %v838_v32 = vsel %vm835_vm2, %v2998_v45, 24.0 }
 0x4b9   :  { %v416_v30 = vsel %vm238_vm8, %v409_v29, inf  ;;  %v841_v22 = vsel %vm238_vm8, %v838_v32, inf }
 0x4ba   :  { %417 = vmin.xlane.f32.xlu0 %v416_v30  ;;  %v831_v36 = vpop.xlane.xlu0 %830  ;;  %842 = vmin.xlane.f32.xlu1 %v841_v22  ;;  %v834_v39 = vpop.xlane.xlu1 %833 }
 0x4bb   :  { %vm836_vm3 = vcmp.le.f32.partialorder %v2980_v35, %v831_v36  ;;  %vm837_vm4 = vcmp.le.f32.partialorder %v2991_v41, %v834_v39 }
 0x4bc   :  { %v839_v33 = vsel %vm836_vm3, %v2998_v45, 24.0  ;;  %v840_v42 = vsel %vm837_vm4, %v2998_v45, 24.0 }
 0x4bd   :  { %v844_v38 = vsel %vm238_vm8, %v839_v33, inf  ;;  %v847_v43 = vsel %vm238_vm8, %v840_v42, inf }
 0x4be   :  { %845 = vmin.xlane.f32.xlu0 %v844_v38  ;;  %848 = vmin.xlane.f32.xlu1 %v847_v43 }
 0x527   :  { %v334_v47 = vpop.xlane.xlu0 %333 }
 0x528   :  { %vm341_vm5 = vcmp.eq.f32.partialorder %v2998_v45, %v334_v47 }
 0x529   :  { %v2248_v48 = vsel %vm341_vm5, 1.0, %v2741_v25  ;;  %v3213_v49 = vsel %vm341_vm5, 1e+30, %v3096_v0 }
 0x52a   :  { %350 = vst.msk [vmem:[#allocation2 + $0x30] sm:$0xff] %vm238_vm8, %v2248_v48  ;;  %v356_v50 = vsel %vm238_vm8, %v3213_v49, inf }
 0x52b   :  { %357 = vmin.xlane.f32.xlu0 %v356_v50  ;;  %v337_v51 = vpop.xlane.xlu1 %336 }
 0x52c   :  { %vm342_vm6 = vcmp.eq.f32.partialorder %v2998_v45, %v337_v51 }
 0x52d   :  { %v2249_v52 = vsel %vm342_vm6, 1.0, %v2741_v25  ;;  %v3221_v53 = vsel %vm342_vm6, 1e+30, %v3104_v7 }
 0x52e   :  { %351 = vst.msk [vmem:[#allocation2 + $0x38] sm:$0xff] %vm238_vm8, %v2249_v52  ;;  %v359_v0 = vsel %vm238_vm8, %v3221_v53, inf }
 0x52f   :  { %v340_v54 = vpop.xlane.xlu0 %339  ;;  %360 = vmin.xlane.f32.xlu1 %v359_v0 }
 0x530   :  { %vm343_vm7 = vcmp.eq.f32.partialorder %v2998_v45, %v340_v54 }
 0x531   :  { %v2250_v55 = vsel %vm343_vm7, 1.0, %v2741_v25  ;;  %v3228_v56 = vld [vmem:[#allocation2 + $0x30] sm:$0xff]  ;;  %v3231_v57 = vsel %vm343_vm7, 1e+30, %v3112_v12 }
 0x532   :  { %352 = vst.msk [vmem:[#allocation2 + $0x40] sm:$0xff] %vm238_vm8, %v2250_v55  ;;  %2564 = vmatprep.mubr.msk.f32.mxu0 %vm238_vm8, %v3228_v56  ;;  %v362_v7 = vsel %vm238_vm8, %v3231_v57, inf }
 0x533   :  { %363 = vmin.xlane.f32.xlu0 %v362_v7  ;;  %v412_v58 = vpop.xlane.xlu0 %411 }
 0x534   :  { %vm419_vm9 = vcmp.eq.f32.partialorder %v2998_v45, %v412_v58 }
 0x535   :  { %v2254_v59 = vsel %vm419_vm9, 1.0, %v2741_v25  ;;  %v3240_v60 = vld [vmem:[#allocation2 + $0x38] sm:$0xff]  ;;  %v3243_v61 = vsel %vm419_vm9, 1e+30, %v2930_v2 }
 0x536   :  { %428 = vst.msk [vmem:[#allocation2 + $0x60] sm:$0xff] %vm238_vm8, %v2254_v59  ;;  %2565 = vmatmul.mubr.msk.f32.gmra.mxu0 %vm238_vm8, %v3240_v60  ;;  %v434_v12 = vsel %vm238_vm8, %v3243_v61, inf }
 0x537   :  { %435 = vmin.xlane.f32.xlu0 %v434_v12  ;;  %v765_v62 = vpop.xlane.xlu1 %764 }
 0x538   :  { %vm772_vm10 = vcmp.eq.f32.partialorder %v2998_v45, %v765_v62 }
 0x539   :  { %v2280_v63 = vsel %vm772_vm10, 1.0, %v2741_v25  ;;  %v3252_v1 = vld [vmem:[#allocation2 + $0x40] sm:$0xff]  ;;  %v3255_v5 = vsel %vm772_vm10, 1e+30, %v3127_v23 }
 0x53a   :  { %781 = vst.msk [vmem:[#allocation2 + $0xc0] sm:$0xff] %vm238_vm8, %v2280_v63  ;;  %2567 = vmatprep.mubr.msk.f32.mxu0 %vm238_vm8, %v3252_v1  ;;  %v787_v2 = vsel %vm238_vm8, %v3255_v5, inf }
 0x53b   :  { %788 = vmin.xlane.f32.xlu1 %v787_v2  ;;  %v768_v6 = vpop.xlane.xlu1 %767 }
 0x53c   :  { %vm773_vm11 = vcmp.eq.f32.partialorder %v2998_v45, %v768_v6 }
 0x53d   :  { %v2281_v3 = vsel %vm773_vm11, 1.0, %v2741_v25  ;;  %v3265_v4 = vsel %vm773_vm11, 1e+30, %v3139_v34 }
 0x53e   :  { %782 = vst.msk [vmem:[#allocation2 + $0xc8] sm:$0xff] %vm238_vm8, %v2281_v3  ;;  %v790_v23 = vsel %vm238_vm8, %v3265_v4, inf }
 0x53f   :  { %v771_v10 = vpop.xlane.xlu0 %770  ;;  %791 = vmin.xlane.f32.xlu1 %v790_v23  ;;  %v415_v11 = vpop.xlane.xlu1 %414 }
 0x540   :  { %vm774_vm12 = vcmp.eq.f32.partialorder %v2998_v45, %v771_v10  ;;  %vm420_vm13 = vcmp.eq.f32.partialorder %v2998_v45, %v415_v11 }
 0x541   :  { %v2282_v8 = vsel %vm774_vm12, 1.0, %v2741_v25  ;;  %v2255_v19 = vsel %vm420_vm13, 1.0, %v2741_v25  ;;  %v3274_v13 = vld [vmem:[#allocation2 + $0xc0] sm:$0xff]  ;;  %v3277_v34 = vsel %vm774_vm12, 1e+30, %v3147_v37 }
 0x542   :  { %783 = vst.msk [vmem:[#allocation2 + $0xd0] sm:$0xff] %vm238_vm8, %v2282_v8  ;;  %429 = vst.msk [vmem:[#allocation2 + $0x68] sm:$0xff] %vm238_vm8, %v2255_v19  ;;  %2597 = vmatprep.mubr.msk.f32.mxu1 %vm238_vm8, %v3274_v13  ;;  %v793_v21 = vsel %vm238_vm8, %v3277_v34, inf  ;;  %v3286_v29 = vsel %vm420_vm13, 1e+30, %v2941_v9 }
 0x543   :  { %794 = vmin.xlane.f32.xlu0 %v793_v21  ;;  %v418_v32 = vpop.xlane.xlu0 %417  ;;  %v437_v30 = vsel %vm238_vm8, %v3286_v29, inf  ;;  %v843_v37 = vpop.xlane.xlu1 %842 }
 0x544   :  { %vm421_vm14 = vcmp.eq.f32.partialorder %v2998_v45, %v418_v32  ;;  %438 = vmin.xlane.f32.xlu1 %v437_v30  ;;  %vm850_vm15 = vcmp.eq.f32.partialorder %v2998_v45, %v843_v37 }
 0x545   :  { %v2256_v22 = vsel %vm421_vm14, 1.0, %v2741_v25  ;;  %v2286_v36 = vsel %vm850_vm15, 1.0, %v2741_v25  ;;  %v3294_v39 = vld [vmem:[#allocation2 + $0xc8] sm:$0xff]  ;;  %v3297_v9 = vsel %vm421_vm14, 1e+30, %v2958_v18 }
 0x546   :  { %430 = vst.msk [vmem:[#allocation2 + $0x70] sm:$0xff] %vm238_vm8, %v2256_v22  ;;  %859 = vst.msk [vmem:[#allocation2 + $0xf0] sm:$0xff] %vm238_vm8, %v2286_v36  ;;  %2598 = vmatmul.mubr.msk.f32.gmra.mxu1 %vm238_vm8, %v3294_v39  ;;  %v440_v33 = vsel %vm238_vm8, %v3297_v9, inf  ;;  %v3306_v42 = vsel %vm850_vm15, 1e+30, %v2969_v28 }
 0x547   :  { %441 = vmin.xlane.f32.xlu0 %v440_v33  ;;  %v846_v38 = vpop.xlane.xlu0 %845  ;;  %v865_v43 = vsel %vm238_vm8, %v3306_v42, inf  ;;  %v849_v18 = vpop.xlane.xlu1 %848 }
 0x548   :  { %vm851_vm1 = vcmp.eq.f32.partialorder %v2998_v45, %v846_v38  ;;  %866 = vmin.xlane.f32.xlu1 %v865_v43  ;;  %vm852_vm2 = vcmp.eq.f32.partialorder %v2998_v45, %v849_v18 }
 0x549   :  { %v2287_v47 = vsel %vm851_vm1, 1.0, %v2741_v25  ;;  %v2288_v48 = vsel %vm852_vm2, 1.0, %v2741_v25  ;;  %v3314_v50 = vld [vmem:[#allocation2 + $0xd0] sm:$0xff]  ;;  %v3317_v28 = vsel %vm851_vm1, 1e+30, %v2980_v35 }
 0x54a   :  { %860 = vst.msk [vmem:[#allocation2 + $0xf8] sm:$0xff] %vm238_vm8, %v2287_v47  ;;  %861 = vst.msk [vmem:[#allocation2 + $0x100] sm:$0xff] %vm238_vm8, %v2288_v48  ;;  %2600 = vmatprep.mubr.msk.f32.mxu1 %vm238_vm8, %v3314_v50  ;;  %v868_v51 = vsel %vm238_vm8, %v3317_v28, inf  ;;  %v864_v52 = vsel %vm852_vm2, 1e+30, %v2991_v41 }
 0x54b   :  { %869 = vmin.xlane.f32.xlu0 %v868_v51  ;;  %v871_v0 = vsel %vm238_vm8, %v864_v52, inf }
 0x54c   :  { %872 = vmin.xlane.f32.xlu1 %v871_v0 }
 0x5b4   :  { %v358_v54 = vpop.xlane.xlu0 %357 }
 0x5b5   :  { %vm365_vm3 = vcmp.le.f32.partialorder %v3213_v49, %v358_v54 }
 0x5b6   :  { %v368_v35 = vsel %vm365_vm3, %v2998_v45, 24.0 }
 0x5b7   :  { %v371_v55 = vsel %vm238_vm8, %v368_v35, inf }
 0x5b8   :  { %372 = vmin.xlane.f32.xlu0 %v371_v55  ;;  %v361_v7 = vpop.xlane.xlu1 %360 }
 0x5b9   :  { %vm366_vm4 = vcmp.le.f32.partialorder %v3221_v53, %v361_v7 }
 0x5ba   :  { %v369_v58 = vsel %vm366_vm4, %v2998_v45, 24.0 }
 0x5bb   :  { %v374_v59 = vsel %vm238_vm8, %v369_v58, inf }
 0x5bc   :  { %v364_v41 = vpop.xlane.xlu0 %363  ;;  %375 = vmin.xlane.f32.xlu1 %v374_v59  ;;  %v3389_v59 = vld [vmem:[#allocation2 + $0x60] sm:$0xff] }
 0x5bd   :  { %vm367_vm5 = vcmp.le.f32.partialorder %v3231_v57, %v364_v41 }
 0x5be   :  { %v370_v12 = vsel %vm367_vm5, %v2998_v45, 24.0 }
 0x5bf   :  { %v377_v49 = vsel %vm238_vm8, %v370_v12, inf }
 0x5c0   :  { %378 = vmin.xlane.f32.xlu0 %v377_v49  ;;  %v436_v62 = vpop.xlane.xlu0 %435  ;;  %v3395_v49 = vld [vmem:[#allocation2 + $0x68] sm:$0xff] }
 0x5c1   :  { %vm443_vm6 = vcmp.le.f32.partialorder %v3243_v61, %v436_v62  ;;  %v3400_v62 = vld [vmem:[#allocation2 + $0x70] sm:$0xff] }
 0x5c2   :  { %v446_v63 = vsel %vm443_vm6, %v2998_v45, 24.0 }
 0x5c3   :  { %v449_v53 = vsel %vm238_vm8, %v446_v63, inf }
 0x5c4   :  { %450 = vmin.xlane.f32.xlu0 %v449_v53  ;;  %v789_v2 = vpop.xlane.xlu1 %788 }
 0x5c5   :  { %vm796_vm7 = vcmp.le.f32.partialorder %v3255_v5, %v789_v2 }
 0x5c6   :  { %v799_v6 = vsel %vm796_vm7, %v2998_v45, 24.0 }
 0x5c7   :  { %v802_v57 = vsel %vm238_vm8, %v799_v6, inf }
 0x5c8   :  { %803 = vmin.xlane.f32.xlu1 %v802_v57  ;;  %v792_v3 = vpop.xlane.xlu1 %791 }
 0x5c9   :  { %vm797_vm9 = vcmp.le.f32.partialorder %v3265_v4, %v792_v3 }
 0x5ca   :  { %v800_v23 = vsel %vm797_vm9, %v2998_v45, 24.0 }
 0x5cb   :  { %v805_v61 = vsel %vm238_vm8, %v800_v23, inf }
 0x5cc   :  { %v795_v10 = vpop.xlane.xlu0 %794  ;;  %806 = vmin.xlane.f32.xlu1 %v805_v61 }
 0x5cd   :  { %vm798_vm10 = vcmp.le.f32.partialorder %v3277_v34, %v795_v10  ;;  %v439_v11 = vpop.xlane.xlu1 %438 }
 0x5ce   :  { %vm444_vm11 = vcmp.le.f32.partialorder %v3286_v29, %v439_v11  ;;  %v801_v5 = vsel %vm798_vm10, %v2998_v45, 24.0 }
 0x5cf   :  { %v808_v8 = vsel %vm238_vm8, %v801_v5, inf  ;;  %v447_v19 = vsel %vm444_vm11, %v2998_v45, 24.0 }
 0x5d0   :  { %809 = vmin.xlane.f32.xlu0 %v808_v8  ;;  %v442_v21 = vpop.xlane.xlu0 %441  ;;  %v452_v4 = vsel %vm238_vm8, %v447_v19, inf }
 0x5d1   :  { %vm445_vm12 = vcmp.le.f32.partialorder %v3297_v9, %v442_v21  ;;  %453 = vmin.xlane.f32.xlu1 %v452_v4  ;;  %v867_v32 = vpop.xlane.xlu1 %866 }
 0x5d2   :  { %vm874_vm13 = vcmp.le.f32.partialorder %v3306_v42, %v867_v32  ;;  %v448_v34 = vsel %vm445_vm12, %v2998_v45, 24.0 }
 0x5d3   :  { %v455_v29 = vsel %vm238_vm8, %v448_v34, inf  ;;  %v877_v30 = vsel %vm874_vm13, %v2998_v45, 24.0 }
 0x5d4   :  { %456 = vmin.xlane.f32.xlu0 %v455_v29  ;;  %v870_v37 = vpop.xlane.xlu0 %869  ;;  %v880_v22 = vsel %vm238_vm8, %v877_v30, inf  ;;  %v3439_v29 = vld [vmem:[#allocation2 + $0xf0] sm:$0xff]  ;;  %v3448_v30 = vld [vmem:[#allocation2 + $0xf8] sm:$0xff] }
 0x5d5   :  { %vm875_vm14 = vcmp.le.f32.partialorder %v3317_v28, %v870_v37  ;;  %881 = vmin.xlane.f32.xlu1 %v880_v22  ;;  %v873_v36 = vpop.xlane.xlu1 %872  ;;  %3774 = vst [vmem:[#allocation6_spill] sm:$0xff] %v3448_v30 }
 0x5d6   :  { %vm876_vm15 = vcmp.le.f32.partialorder %v864_v52, %v873_v36  ;;  %v878_v9 = vsel %vm875_vm14, %v2998_v45, 24.0  ;;  %vm1436_vm14 = vcmask 523264  }
 0x5d7   :  { %v883_v33 = vsel %vm238_vm8, %v878_v9, inf  ;;  %v879_v42 = vsel %vm876_vm15, %v2998_v45, 24.0  ;;  %v908_v9 = vld [vmem:[%s3755_s2 + $0x38] sm:$0xff] }
 0x5d8   :  { %884 = vmin.xlane.f32.xlu0 %v883_v33  ;;  %v886_v38 = vsel %vm238_vm8, %v879_v42, inf  ;;  %2615 = vmatprep.subr.mxu0 %v908_v9  ;;  %v2557_v33 = vpop.f32.mrf.mxu0 }
 0x5d9   :  { %887 = vmin.xlane.f32.xlu1 %v886_v38  ;;  %2616 = vmatpush3.msra.mxu0 %v908_v9  ;;  %v903_v9 = vld [vmem:[%s3755_s2 + $0x10] sm:$0xff] }
 0x5da   :  { %v1048_v42 = vpop.f32.mrf.mxu0 }
 0x5dc   :  { %v2560_v38 = vpop.f32.mrf.mxu0 }
 0x641   :  { %v373_v43 = vpop.xlane.xlu0 %372 }
 0x642   :  { %vm380_vm1 = vcmp.eq.f32.partialorder %v2998_v45, %v373_v43  ;;  %v1058_v43 = vpop.f32.mrf.mxu0 }
 0x643   :  { %v2251_v18 = vsel %vm380_vm1, 1.0, %v2741_v25 }
 0x644   :  { %389 = vst.msk [vmem:[#allocation2 + $0x48] sm:$0xff] %vm238_vm8, %v2251_v18  ;;  %v2563_v18 = vpop.f32.mrf.mxu0 }
 0x645   :  { %v376_v47 = vpop.xlane.xlu1 %375 }
 0x646   :  { %vm381_vm2 = vcmp.eq.f32.partialorder %v2998_v45, %v376_v47  ;;  %v3475_v47 = vpop.f32.mrf.mxu1 }
 0x647   :  { %v2252_v48 = vsel %vm381_vm2, 1.0, %v2741_v25 }
 0x648   :  { %390 = vst.msk [vmem:[#allocation2 + $0x50] sm:$0xff] %vm238_vm8, %v2252_v48  ;;  %v1068_v48 = vpop.f32.mrf.mxu0 }
 0x649   :  { %v379_v28 = vpop.xlane.xlu0 %378 }
 0x64a   :  { %vm382_vm3 = vcmp.eq.f32.partialorder %v2998_v45, %v379_v28  ;;  %v2566_v28 = vpop.f32.mrf.mxu0 }
 0x64b   :  { %v2253_v51 = vsel %vm382_vm3, 1.0, %v2741_v25  ;;  %v3370_v52 = vld [vmem:[#allocation2 + $0x48] sm:$0xff] }
 0x64c   :  { %391 = vst.msk [vmem:[#allocation2 + $0x58] sm:$0xff] %vm238_vm8, %v2253_v51  ;;  %2568 = vmatmul.mubr.msk.f32.gmra.mxu0 %vm238_vm8, %v3370_v52  ;;  %v1290_v51 = vpop.f32.mrf.mxu1 }
 0x64d   :  { %v451_v0 = vpop.xlane.xlu0 %450 }
 0x64e   :  { %vm458_vm4 = vcmp.eq.f32.partialorder %v2998_v45, %v451_v0  ;;  %v2593_v0 = vpop.f32.mrf.mxu1 }
 0x64f   :  { %v2257_v54 = vsel %vm458_vm4, 1.0, %v2741_v25  ;;  %v3377_v35 = vld [vmem:[#allocation2 + $0x50] sm:$0xff] }
 0x650   :  { %467 = vst.msk [vmem:[#allocation2 + $0x78] sm:$0xff] %vm238_vm8, %v2257_v54  ;;  %2570 = vmatprep.mubr.msk.f32.mxu0 %vm238_vm8, %v3377_v35  ;;  %v1078_v54 = vpop.f32.mrf.mxu0 }
 0x651   :  { %v804_v55 = vpop.xlane.xlu1 %803 }
 0x652   :  { %vm811_vm5 = vcmp.eq.f32.partialorder %v2998_v45, %v804_v55 }
 0x653   :  { %v2283_v7 = vsel %vm811_vm5, 1.0, %v2741_v25  ;;  %v3384_v58 = vld [vmem:[#allocation2 + $0x58] sm:$0xff] }
 0x654   :  { %820 = vst.msk [vmem:[#allocation2 + $0xd8] sm:$0xff] %vm238_vm8, %v2283_v7  ;;  %2571 = vmatmul.mubr.msk.f32.gmra.mxu0 %vm238_vm8, %v3384_v58 }
 0x655   :  { %2573 = vmatprep.mubr.msk.f32.mxu0 %vm238_vm8, %v3389_v59  ;;  %v807_v41 = vpop.xlane.xlu1 %806 }
 0x656   :  { %vm812_vm6 = vcmp.eq.f32.partialorder %v2998_v45, %v807_v41 }
 0x657   :  { %v2284_v12 = vsel %vm812_vm6, 1.0, %v2741_v25  ;;  %v3407_v6 = vld [vmem:[#allocation2 + $0x78] sm:$0xff] }
 0x658   :  { %821 = vst.msk [vmem:[#allocation2 + $0xe0] sm:$0xff] %vm238_vm8, %v2284_v12  ;;  %2574 = vmatmul.mubr.msk.f32.gmra.mxu0 %vm238_vm8, %v3395_v49  ;;  %3771 = vst [vmem:[#allocation3_spill] sm:$0xff] %v3407_v6 }
 0x659   :  { %v810_v63 = vpop.xlane.xlu0 %809  ;;  %2576 = vmatprep.mubr.msk.f32.mxu0 %vm238_vm8, %v3400_v62 }
 0x65a   :  { %vm813_vm7 = vcmp.eq.f32.partialorder %v2998_v45, %v810_v63  ;;  %v454_v53 = vpop.xlane.xlu1 %453  ;;  %v907_v63 = vld [vmem:[%s3755_s2 + $0x30] sm:$0xff] }
 0x65b   :  { %v2285_v2 = vsel %vm813_vm7, 1.0, %v2741_v25  ;;  %vm459_vm9 = vcmp.eq.f32.partialorder %v2998_v45, %v454_v53  ;;  %v3409_v57 = vld [vmem:[#allocation2 + $0xd8] sm:$0xff]  ;;  %v1137_v53 = vmax.f32 %v1048_v42, %v2560_v38  ;;  %2617 = vmatprep.subr.mxu0 %v907_v63 }
 0x65c   :  { %822 = vst.msk [vmem:[#allocation2 + $0xe8] sm:$0xff] %vm238_vm8, %v2285_v2  ;;  %v2258_v3 = vsel %vm459_vm9, 1.0, %v2741_v25  ;;  %2577 = vmatmul.mubr.msk.f32.gmra.mxu0 %vm238_vm8, %v3407_v6  ;;  %2601 = vmatmul.mubr.msk.f32.gmra.mxu1 %vm238_vm8, %v3409_v57  ;;  %v906_v2 = vld [vmem:[%s3755_s2 + $0x28] sm:$0xff] }
 0x65d   :  { %468 = vst.msk [vmem:[#allocation2 + $0x80] sm:$0xff] %vm238_vm8, %v2258_v3  ;;  %v457_v23 = vpop.xlane.xlu0 %456  ;;  %2618 = vmatpush3.msra.mxu0 %v907_v63  ;;  %v902_v63 = vld [vmem:[%s3755_s2 + $0x8] sm:$0xff] }
 0x65e   :  { %vm460_vm10 = vcmp.eq.f32.partialorder %v2998_v45, %v457_v23  ;;  %v882_v61 = vpop.xlane.xlu1 %881  ;;  %2619 = vmatprep.subr.mxu0 %v906_v2 }
 0x65f   :  { %v2259_v10 = vsel %vm460_vm10, 1.0, %v2741_v25  ;;  %vm889_vm11 = vcmp.eq.f32.partialorder %v2998_v45, %v882_v61  ;;  %v3421_v11 = vld [vmem:[#allocation2 + $0xe0] sm:$0xff]  ;;  %2620 = vmatpush3.msra.mxu0 %v906_v2 }
 0x660   :  { %469 = vst.msk [vmem:[#allocation2 + $0x88] sm:$0xff] %vm238_vm8, %v2259_v10  ;;  %v2289_v5 = vsel %vm889_vm11, 1.0, %v2741_v25  ;;  %2603 = vmatprep.mubr.msk.f32.mxu1 %vm238_vm8, %v3421_v11  ;;  %v905_v61 = vld [vmem:[%s3755_s2 + $0x20] sm:$0xff]  ;;  %v1140_v10 = vmax.f32 %v1137_v53, %v1078_v54 }
 0x661   :  { %898 = vst.msk [vmem:[#allocation2 + $0x108] sm:$0xff] %vm238_vm8, %v2289_v5  ;;  %v885_v8 = vpop.xlane.xlu0 %884  ;;  %2621 = vmatprep.subr.mxu0 %v905_v61 }
 0x662   :  { %vm890_vm12 = vcmp.eq.f32.partialorder %v2998_v45, %v885_v8  ;;  %v888_v19 = vpop.xlane.xlu1 %887  ;;  %2622 = vmatpush3.msra.mxu0 %v905_v61 }
 0x663   :  { %v2290_v21 = vsel %vm890_vm12, 1.0, %v2741_v25  ;;  %vm891_vm13 = vcmp.eq.f32.partialorder %v2998_v45, %v888_v19  ;;  %v3431_v4 = vld [vmem:[#allocation2 + $0xe8] sm:$0xff]  ;;  %v904_v19 = vld [vmem:[%s3755_s2 + $0x18] sm:$0xff] }
 0x664   :  { %899 = vst.msk [vmem:[#allocation2 + $0x110] sm:$0xff] %vm238_vm8, %v2290_v21  ;;  %v2291_v32 = vsel %vm891_vm13, 1.0, %v2741_v25  ;;  %v3435_v34 = vld [vmem:[#allocation2 + $0x80] sm:$0xff]  ;;  %2604 = vmatmul.mubr.msk.f32.gmra.mxu1 %vm238_vm8, %v3431_v4  ;;  %2623 = vmatprep.subr.mxu0 %v904_v19 }
 0x665   :  { %3772 = vst [vmem:[#allocation4_spill] sm:$0xff] %v3435_v34  ;;  %900 = vst.msk [vmem:[#allocation2 + $0x118] sm:$0xff] %vm238_vm8, %v2291_v32  ;;  %2579 = vmatprep.mubr.msk.f32.mxu0 %vm238_vm8, %v3435_v34  ;;  %2606 = vmatprep.mubr.msk.f32.mxu1 %vm238_vm8, %v3439_v29  ;;  %v3454_v25 = vld [vmem:[#allocation2 + $0x100] sm:$0xff] }
 0x666   :  { %3775 = vst [vmem:[#allocation7_spill] sm:$0xff] %v3454_v25  ;;  %2624 = vmatpush3.msra.mxu0 %v904_v19 }
 0x667   :  { %v3446_v45 = vld [vmem:[#allocation2 + $0x88] sm:$0xff]  ;;  %2625 = vmatprep.subr.mxu0 %v903_v9 }
 0x668   :  { %3773 = vst [vmem:[#allocation5_spill] sm:$0xff] %v3446_v45  ;;  %2580 = vmatmul.mubr.msk.f32.gmra.mxu0 %vm238_vm8, %v3446_v45  ;;  %2607 = vmatmul.mubr.msk.f32.gmra.mxu1 %vm238_vm8, %v3448_v30  ;;  %v3458_v37 = vld [vmem:[#allocation2 + $0x108] sm:$0xff] }
 0x669   :  { %2609 = vmatprep.mubr.msk.f32.mxu1 %vm238_vm8, %v3454_v25  ;;  %3776 = vst [vmem:[#allocation8_spill] sm:$0xff] %v3458_v37  ;;  %2626 = vmatpush3.msra.mxu0 %v903_v9 }
 0x66a   :  { %2627 = vmatprep.subr.mxu0 %v902_v63 }
 0x66b   :  { %v3460_v22 = vld [vmem:[#allocation2 + $0x110] sm:$0xff]  ;;  %2628 = vmatpush3.msra.mxu0 %v902_v63 }
 0x66c   :  { %3777 = vst [vmem:[#allocation9_spill] sm:$0xff] %v3460_v22  ;;  %2610 = vmatmul.mubr.msk.f32.gmra.mxu1 %vm238_vm8, %v3458_v37  ;;  %v3466_v36 = vld [vmem:[#allocation2 + $0x118] sm:$0xff] }
 0x66d   :  { %2612 = vmatprep.mubr.msk.f32.mxu1 %vm238_vm8, %v3460_v22  ;;  %3778 = vst [vmem:[#allocation10_spill] sm:$0xff] %v3466_v36 }
 0x670   :  { %2613 = vmatmul.mubr.msk.f32.gmra.mxu1 %vm238_vm8, %v3466_v36 }
 0x671   :  { %2646 = vmatprep.mubr.msk.f32.mxu1 %vm238_vm8, %v3039_v14  ;;  %v1300_v14 = vpop.f32.mrf.mxu1 }
 0x673   :  { %v2596_v7 = vpop.f32.mrf.mxu1 }
 0x674   :  { %v1381_v34 = vmax.f32 %v1300_v14, %v2596_v7 }
 0x675   :  { %v1310_v3 = vpop.f32.mrf.mxu1 }
 0x677   :  { %v2599_v5 = vpop.f32.mrf.mxu1 }
 0x679   :  { %v1320_v38 = vpop.f32.mrf.mxu1 }
 0x70c   :  { %v2569_v55 = vpop.f32.mrf.mxu0 }
 0x70d   :  { %v1143_v21 = vmax.f32 %v1140_v10, %v2569_v55  ;;  %v901_v55 = vld [vmem:[%s3755_s2] sm:$0xff]  ;;  %v1138_v10 = vmax.f32 %v2557_v33, %v1068_v48  ;;  %v1380_v33 = vmax.f32 %v3475_v47, %v1310_v3 }
 0x70e   :  { %v1088_v41 = vpop.f32.mrf.mxu0  ;;  %2629 = vmatprep.subr.mxu0 %v901_v55 }
 0x70f   :  { %2630 = vmatpush3.msra.mxu0 %v901_v55 }
 0x714   :  { %v2572_v12 = vpop.f32.mrf.mxu0 }
 0x716   :  { %v1098_v23 = vpop.f32.mrf.mxu0 }
 0x718   :  { %v2575_v8 = vpop.f32.mrf.mxu0 }
 0x71a   :  { %v1108_v32 = vpop.f32.mrf.mxu0 }
 0x71b   :  { %v1146_v42 = vmax.f32 %v1143_v21, %v1108_v32  ;;  %v1141_v21 = vmax.f32 %v1138_v10, %v2566_v28  ;;  %v1383_v28 = vmax.f32 %v1380_v33, %v2599_v5 }
 0x71c   :  { %v2578_v54 = vpop.f32.mrf.mxu0  ;;  %v2602_v2 = vpop.f32.mrf.mxu1 }
 0x71d   :  { %v1149_v53 = vmax.f32 %v1146_v42, %v2578_v54  ;;  %v1139_v42 = vmax.f32 %v1058_v43, %v2563_v18  ;;  %v1379_v54 = vmax.f32 %v1290_v51, %v2593_v0  ;;  %v1144_v9 = vmax.f32 %v1141_v21, %v1098_v23 }
 0x71e   :  { %v1330_v19 = vpop.f32.mrf.mxu1  ;;  %v1118_v36 = vpop.f32.mrf.mxu0 }
 0x71f   :  { %v1394_v61 = vsub.f32 %v1149_v53, %v2825_v17  ;;  %v1382_v22 = vmax.f32 %v1379_v54, %v1320_v38  ;;  %v1142_v37 = vmax.f32 %v1139_v42, %v1088_v41  ;;  %v1147_v63 = vmax.f32 %v1144_v9, %v2575_v8 }
 0x720   :  { %v1384_v25 = vmax.f32 %v1381_v34, %v1330_v19 }
 0x721   :  { %1406 = vrot.lane.b32.xlu0 %v1394_v61, %s2744_s14  ;;  %v1145_v48 = vmax.f32 %v1142_v37, %v2572_v12  ;;  %v1385_v61 = vmax.f32 %v1382_v22, %v2602_v2 }
 0x723   :  { %v1148_v10 = vmax.f32 %v1145_v48, %v1118_v36  ;;  %v2735_v48 = vld [vmem:[#allocation2 + $0x90] sm:$0xff] }
 0x724   :  { %v2605_v32 = vpop.f32.mrf.mxu1 }
 0x725   :  { %v1387_v51 = vmax.f32 %v1384_v25, %v2605_v32 }
 0x726   :  { %v1340_v45 = vpop.f32.mrf.mxu1 }
 0x727   :  { %v1386_v23 = vmax.f32 %v1383_v28, %v1340_v45 }
 0x728   :  { %v2581_v53 = vpop.f32.mrf.mxu0  ;;  %v2608_v6 = vpop.f32.mrf.mxu1 }
 0x729   :  { %v1151_v38 = vmax.f32 %v1148_v10, %v2581_v53  ;;  %v1389_v12 = vmax.f32 %v1386_v23, %v2608_v6 }
 0x72a   :  { %v1128_v30 = vpop.f32.mrf.mxu0  ;;  %v1350_v55 = vpop.f32.mrf.mxu1 }
 0x72b   :  { %v1150_v43 = vmax.f32 %v1147_v63, %v1128_v30  ;;  %v1388_v18 = vmax.f32 %v1385_v61, %v1350_v55  ;;  %v1396_v22 = vsub.f32 %v1151_v38, %v2823_v16  ;;  %v2328_v55 = vld [vmem:[%s3756_s3] ss:$0 sm:$0xff] }
 0x72c   :  { %v2611_v0 = vpop.f32.mrf.mxu1 }
 0x72d   :  { %v1395_v14 = vsub.f32 %v1150_v43, %v2830_v20  ;;  %v1391_v7 = vmax.f32 %v1388_v18, %v2611_v0 }
 0x72e   :  { %v1360_v41 = vpop.f32.mrf.mxu1 }
 0x72f   :  { %v1397_v47 = vsub.f32 %v1391_v7, %v2842_v27  ;;  %v1390_v37 = vmax.f32 %v1387_v51, %v1360_v41  ;;  %1408 = vrot.lane.b32.xlu1 %v1395_v14, %s2744_s14 }
 0x730   :  { %v2614_v34 = vpop.f32.mrf.mxu1 }
 0x731   :  { %v1393_v36 = vmax.f32 %v1390_v37, %v2614_v34  ;;  %1412 = vrot.lane.b32.xlu0 %v1397_v47, %s2744_s14 }
 0x732   :  { %v1370_v30 = vpop.f32.mrf.mxu1 }
 0x733   :  { %v1399_v45 = vsub.f32 %v1393_v36, %v2840_v26  ;;  %v1392_v25 = vmax.f32 %v1389_v12, %v1370_v30  ;;  %1410 = vrot.lane.b32.xlu1 %v1396_v22, %s2744_s14 }
 0x735   :  { %v1398_v3 = vsub.f32 %v1392_v25, %v2849_v31  ;;  %1416 = vrot.lane.b32.xlu0 %v1399_v45, %s2744_s14 }
 0x737   :  { %1414 = vrot.lane.b32.xlu1 %v1398_v3, %s2744_s14  ;;  %v2740_v3 = vld [vmem:[#allocation2 + $0x18] sm:$0xff] }
 0x793   :  { %v1407_v5 = vpop.permute.xlu0 %1406 }
 0x794   :  { %v1424_v6 = vsel %vm114_vm0, %v2825_v17, %v1407_v5 }
 0x795   :  { %2631 = vmatprep.mubr.msk.f32.mxu0 %vm1436_vm14, %v1424_v6 }
 0x7a1   :  { %v1409_v8 = vpop.permute.xlu1 %1408 }
 0x7a2   :  { %v1425_v2 = vsel %vm114_vm0, %v2830_v20, %v1409_v8 }
 0x7a3   :  { %v1413_v19 = vpop.permute.xlu0 %1412  ;;  %2632 = vmatmul.mubr.msk.f32.vlgmr.msra.gmra.mxu0 %vm1436_vm14, %v1425_v2 }
 0x7a4   :  { %v1427_v42 = vsel %vm114_vm0, %v2842_v27, %v1413_v19 }
 0x7a5   :  { %v1411_v21 = vpop.permute.xlu1 %1410 }
 0x7a6   :  { %v1426_v32 = vsel %vm114_vm0, %v2823_v16, %v1411_v21 }
 0x7a7   :  { %2634 = vmatprep.mubr.msk.f32.mxu0 %vm1436_vm14, %v1426_v32  ;;  %v1417_v54 = vpop.permute.xlu0 %1416 }
 0x7a8   :  { %2635 = vmatmul.mubr.msk.f32.gmra.mxu0 %vm1436_vm14, %v1427_v42  ;;  %v1429_v33 = vsel %vm114_vm0, %v2840_v26, %v1417_v54 }
 0x7a9   :  { %v1415_v9 = vpop.permute.xlu1 %1414 }
 0x7aa   :  { %v1428_v53 = vsel %vm114_vm0, %v2849_v31, %v1415_v9 }
 0x7ab   :  { %2637 = vmatprep.mubr.msk.f32.mxu0 %vm1436_vm14, %v1428_v53 }
 0x7ac   :  { %2638 = vmatmul.mubr.msk.f32.gmra.mxu0 %vm1436_vm14, %v1429_v33 }
 0x7ad   :  { %2679 = vmatprep.mubr.msk.f32.mxu0 %vm238_vm8, %v2735_v48 }
 0x863   :  { %v2633_v63 = vpop.f32.mrf.mxu0 }
 0x864   :  { %v1527_v10 = vadd.f32 %v2633_v63, %v2328_v55 }
 0x865   :  { %v1521_v61 = vpop.f32.mrf.mxu0 }
 0x866   :  { %v1522_v18 = vadd.f32 %v2328_v55, %v1521_v61  ;;  %v1551_v23 = vmax.f32 %v1527_v10, 0.0  ;;  %v2337_v61 = vld [vmem:[%s3755_s2 + $0x50] sm:$0xff] }
 0x868   :  { %v2636_v28 = vpop.f32.mrf.mxu0  ;;  %v1550_v47 = vmax.f32 %v1522_v18, 0.0  ;;  %v3537_v12 = vadd.f32 %v1551_v23, %v2830_v20 }
 0x869   :  { %v1537_v38 = vadd.f32 %v2636_v28, %v2328_v55  ;;  %v2336_v28 = vld [vmem:[%s3755_s2 + $0x48] sm:$0xff] }
 0x86a   :  { %v1531_v43 = vpop.f32.mrf.mxu0  ;;  %v3545_v25 = vadd.f32 %v1550_v47, %v2825_v17  ;;  %v2736_v17 = vld [vmem:[#allocation2 + $0x8] sm:$0xff] }
 0x86b   :  { %v1532_v51 = vadd.f32 %v2328_v55, %v1531_v43  ;;  %v1553_v36 = vmax.f32 %v1537_v38, 0.0 }
 0x86c   :  { %v2639_v0 = vpop.f32.mrf.mxu0 }
 0x86d   :  { %v1552_v14 = vmax.f32 %v1532_v51, 0.0  ;;  %v1547_v7 = vadd.f32 %v2639_v0, %v2328_v55  ;;  %v3555_v20 = vadd.f32 %v1553_v36, %v2842_v27  ;;  %v2738_v27 = vld [vmem:[#allocation2 + $0x98] sm:$0xff] }
 0x86e   :  { %v1541_v41 = vpop.f32.mrf.mxu0 }
 0x86f   :  { %v3534_v37 = vadd.f32 %v1552_v14, %v2823_v16  ;;  %v1555_v34 = vmax.f32 %v1547_v7, 0.0  ;;  %v1542_v22 = vadd.f32 %v2328_v55, %v1541_v41  ;;  %v2335_v14 = vld [vmem:[%s3755_s2 + $0x40] sm:$0xff] }
 0x871   :  { %v3540_v30 = vadd.f32 %v1555_v34, %v2840_v26  ;;  %v1554_v45 = vmax.f32 %v1542_v22, 0.0  ;;  %2640 = vmatprep.subr.mxu1 %v3534_v37  ;;  %v2737_v26 = vld [vmem:[#allocation2 + $0x10] sm:$0xff] }
 0x872   :  { %2641 = vmatpush3.msra.mxu1 %v3534_v37 }
 0x873   :  { %v3548_v16 = vadd.f32 %v1554_v45, %v2849_v31  ;;  %2642 = vmatprep.subr.mxu1 %v3537_v12  ;;  %2673 = vmatprep.subr.mxu0 %v3540_v30  ;;  %v2739_v31 = vld [vmem:[#allocation2 + $0xa0] sm:$0xff] }
 0x874   :  { %2643 = vmatpush3.msra.mxu1 %v3537_v12  ;;  %2674 = vmatpush3.msra.mxu0 %v3540_v30 }
 0x875   :  { %2644 = vmatprep.subr.mxu1 %v3545_v25  ;;  %2675 = vmatprep.subr.mxu0 %v3548_v16 }
 0x876   :  { %2645 = vmatpush3.msra.mxu1 %v3545_v25  ;;  %2676 = vmatpush3.msra.mxu0 %v3548_v16 }
 0x877   :  { %2647 = vmatmul.mubr.msk.f32.vlgmr.msra.gmra.mxu1 %vm238_vm8, %v2736_v17  ;;  %2677 = vmatprep.subr.mxu0 %v3555_v20 }
 0x878   :  { %2649 = vmatprep.mubr.msk.f32.mxu1 %vm238_vm8, %v2737_v26  ;;  %2678 = vmatpush3.msra.mxu0 %v3555_v20 }
 0x879   :  { %2680 = vmatmul.mubr.msk.f32.vlgmr.msra.gmra.mxu0 %vm238_vm8, %v2738_v27 }
 0x87a   :  { %2682 = vmatprep.mubr.msk.f32.mxu0 %vm238_vm8, %v2739_v31 }
 0x87b   :  { %2650 = vmatmul.mubr.msk.f32.gmra.mxu1 %vm238_vm8, %v2740_v3 }
 0x87c   :  { %2652 = vmatprep.mubr.msk.f32.mxu1 %vm238_vm8, %v3118_v15  ;;  %v3779_v15 = vld [vmem:[#allocation6_spill] sm:$0xff] }
 0x87d   :  { %2683 = vmatmul.mubr.msk.f32.gmra.mxu0 %vm238_vm8, %v3149_v40  ;;  %v3781_v40 = vld [vmem:[#allocation3_spill] sm:$0xff] }
 0x87e   :  { %2685 = vmatprep.mubr.msk.f32.mxu0 %vm238_vm8, %v3158_v44  ;;  %v3782_v44 = vld [vmem:[#allocation4_spill] sm:$0xff] }
 0x87f   :  { %2653 = vmatmul.mubr.msk.f32.gmra.mxu1 %vm238_vm8, %v3129_v24  ;;  %v3780_v24 = vld [vmem:[#allocation7_spill] sm:$0xff] }
 0x880   :  { %2655 = vmatprep.mubr.msk.f32.mxu1 %vm238_vm8, %v3228_v56  ;;  %v3784_v56 = vld [vmem:[#allocation9_spill] sm:$0xff] }
 0x881   :  { %2686 = vmatmul.mubr.msk.f32.gmra.mxu0 %vm238_vm8, %v3166_v46  ;;  %v3783_v46 = vld [vmem:[#allocation8_spill] sm:$0xff] }
 0x882   :  { %2688 = vmatprep.mubr.msk.f32.mxu0 %vm238_vm8, %v3274_v13  ;;  %v2342_v13 = vld [vmem:[%s3755_s2 + $0x78] sm:$0xff] }
 0x883   :  { %2656 = vmatmul.mubr.msk.f32.gmra.mxu1 %vm238_vm8, %v3240_v60  ;;  %v3785_v60 = vld [vmem:[#allocation5_spill] sm:$0xff]  ;;  %2706 = vmatprep.subr.mxu1 %v2342_v13 }
 0x884   :  { %2658 = vmatprep.mubr.msk.f32.mxu1 %vm238_vm8, %v3252_v1  ;;  %v3786_v1 = vld [vmem:[#allocation10_spill] sm:$0xff]  ;;  %2707 = vmatpush3.msra.mxu1 %v2342_v13 }
 0x885   :  { %2689 = vmatmul.mubr.msk.f32.gmra.mxu0 %vm238_vm8, %v3294_v39  ;;  %v2341_v39 = vld [vmem:[%s3755_s2 + $0x70] sm:$0xff] }
 0x886   :  { %2691 = vmatprep.mubr.msk.f32.mxu0 %vm238_vm8, %v3314_v50  ;;  %v2340_v50 = vld [vmem:[%s3755_s2 + $0x68] sm:$0xff]  ;;  %2708 = vmatprep.subr.mxu1 %v2341_v39 }
 0x887   :  { %2659 = vmatmul.mubr.msk.f32.gmra.mxu1 %vm238_vm8, %v3370_v52  ;;  %v2339_v52 = vld [vmem:[%s3755_s2 + $0x60] sm:$0xff] }
 0x888   :  { %2661 = vmatprep.mubr.msk.f32.mxu1 %vm238_vm8, %v3377_v35  ;;  %2709 = vmatpush3.msra.mxu1 %v2341_v39  ;;  %v2338_v35 = vld [vmem:[%s3755_s2 + $0x58] sm:$0xff] }
 0x889   :  { %2692 = vmatmul.mubr.msk.f32.gmra.mxu0 %vm238_vm8, %v3409_v57  ;;  %2710 = vmatprep.subr.mxu1 %v2340_v50 }
 0x88a   :  { %2694 = vmatprep.mubr.msk.f32.mxu0 %vm238_vm8, %v3421_v11  ;;  %2711 = vmatpush3.msra.mxu1 %v2340_v50 }
 0x88b   :  { %2662 = vmatmul.mubr.msk.f32.gmra.mxu1 %vm238_vm8, %v3384_v58  ;;  %2712 = vmatprep.subr.mxu1 %v2339_v52 }
 0x88c   :  { %2664 = vmatprep.mubr.msk.f32.mxu1 %vm238_vm8, %v3389_v59  ;;  %2713 = vmatpush3.msra.mxu1 %v2339_v52 }
 0x88d   :  { %2695 = vmatmul.mubr.msk.f32.gmra.mxu0 %vm238_vm8, %v3431_v4  ;;  %2714 = vmatprep.subr.mxu1 %v2338_v35 }
 0x88e   :  { %2697 = vmatprep.mubr.msk.f32.mxu0 %vm238_vm8, %v3439_v29  ;;  %2715 = vmatpush3.msra.mxu1 %v2338_v35 }
 0x88f   :  { %2665 = vmatmul.mubr.msk.f32.gmra.mxu1 %vm238_vm8, %v3395_v49  ;;  %2716 = vmatprep.subr.mxu1 %v2337_v61 }
 0x890   :  { %2667 = vmatprep.mubr.msk.f32.mxu1 %vm238_vm8, %v3400_v62  ;;  %2717 = vmatpush3.msra.mxu1 %v2337_v61 }
 0x891   :  { %2698 = vmatmul.mubr.msk.f32.gmra.mxu0 %vm238_vm8, %v3779_v15  ;;  %2718 = vmatprep.subr.mxu1 %v2336_v28 }
 0x892   :  { %2700 = vmatprep.mubr.msk.f32.mxu0 %vm238_vm8, %v3780_v24  ;;  %2719 = vmatpush3.msra.mxu1 %v2336_v28 }
 0x893   :  { %2668 = vmatmul.mubr.msk.f32.gmra.mxu1 %vm238_vm8, %v3781_v40  ;;  %2720 = vmatprep.subr.mxu1 %v2335_v14 }
 0x894   :  { %2670 = vmatprep.mubr.msk.f32.mxu1 %vm238_vm8, %v3782_v44  ;;  %2721 = vmatpush3.msra.mxu1 %v2335_v14 }
 0x895   :  { %2701 = vmatmul.mubr.msk.f32.gmra.mxu0 %vm238_vm8, %v3783_v46 }
 0x896   :  { %2703 = vmatprep.mubr.msk.f32.mxu0 %vm238_vm8, %v3784_v56 }
 0x897   :  { %2671 = vmatmul.mubr.msk.f32.gmra.mxu1 %vm238_vm8, %v3785_v60 }
 0x899   :  { %2704 = vmatmul.mubr.msk.f32.gmra.mxu0 %vm238_vm8, %v3786_v1  ;;  %vm2149_vm8 = vcmask 64512  }
 0x937   :  { %v2648_v58 = vpop.f32.mrf.mxu1 }
 0x939   :  { %v1639_v59 = vpop.f32.mrf.mxu1  ;;  %v2681_v49 = vpop.f32.mrf.mxu0 }
 0x93b   :  { %v2651_v62 = vpop.f32.mrf.mxu1  ;;  %v1809_v57 = vpop.f32.mrf.mxu0 }
 0x93c   :  { %v1728_v33 = vmax.f32 %v1639_v59, %v2651_v62 }
 0x93d   :  { %v1649_v11 = vpop.f32.mrf.mxu1  ;;  %v2684_v4 = vpop.f32.mrf.mxu0 }
 0x93e   :  { %v1898_v0 = vmax.f32 %v1809_v57, %v2684_v4 }
 0x93f   :  { %v2654_v29 = vpop.f32.mrf.mxu1  ;;  %v1819_v5 = vpop.f32.mrf.mxu0 }
 0x940   :  { %v1730_v18 = vmax.f32 %v1649_v11, %v2654_v29 }
 0x941   :  { %v1659_v6 = vpop.f32.mrf.mxu1  ;;  %v2687_v8 = vpop.f32.mrf.mxu0 }
 0x942   :  { %v1729_v51 = vmax.f32 %v2648_v58, %v1659_v6  ;;  %v1900_v26 = vmax.f32 %v1819_v5, %v2687_v8 }
 0x943   :  { %v2657_v2 = vpop.f32.mrf.mxu1  ;;  %v1829_v19 = vpop.f32.mrf.mxu0 }
 0x944   :  { %v1899_v7 = vmax.f32 %v2681_v49, %v1829_v19  ;;  %v1732_v45 = vmax.f32 %v1729_v51, %v2657_v2 }
 0x945   :  { %v1669_v21 = vpop.f32.mrf.mxu1  ;;  %v2690_v32 = vpop.f32.mrf.mxu0 }
 0x946   :  { %v1731_v55 = vmax.f32 %v1728_v33, %v1669_v21  ;;  %v1902_v3 = vmax.f32 %v1899_v7, %v2690_v32 }
 0x947   :  { %v2660_v42 = vpop.f32.mrf.mxu1  ;;  %v1839_v54 = vpop.f32.mrf.mxu0 }
 0x948   :  { %v1734_v41 = vmax.f32 %v1731_v55, %v2660_v42  ;;  %v1901_v34 = vmax.f32 %v1898_v0, %v1839_v54 }
 0x949   :  { %v1679_v9 = vpop.f32.mrf.mxu1  ;;  %v2693_v53 = vpop.f32.mrf.mxu0 }
 0x94a   :  { %v1733_v47 = vmax.f32 %v1730_v18, %v1679_v9  ;;  %v1904_v44 = vmax.f32 %v1901_v34, %v2693_v53 }
 0x94b   :  { %v2663_v48 = vpop.f32.mrf.mxu1  ;;  %v1849_v63 = vpop.f32.mrf.mxu0 }
 0x94c   :  { %v1736_v15 = vmax.f32 %v1733_v47, %v2663_v48  ;;  %v1903_v60 = vmax.f32 %v1900_v26, %v1849_v63 }
 0x94d   :  { %v1689_v10 = vpop.f32.mrf.mxu1  ;;  %v2696_v43 = vpop.f32.mrf.mxu0 }
 0x94e   :  { %v1735_v24 = vmax.f32 %v1732_v45, %v1689_v10  ;;  %v1906_v57 = vmax.f32 %v1903_v60, %v2696_v43 }
 0x94f   :  { %v2666_v23 = vpop.f32.mrf.mxu1  ;;  %v1859_v38 = vpop.f32.mrf.mxu0 }
 0x950   :  { %v1905_v1 = vmax.f32 %v1902_v3, %v1859_v38  ;;  %v1738_v35 = vmax.f32 %v1735_v24, %v2666_v23  ;;  %v2380_v23 = vld [vmem:[%s3756_s3 + $0x1] ss:$0 sm:$0xff] }
 0x951   :  { %v1699_v22 = vpop.f32.mrf.mxu1  ;;  %v2699_v36 = vpop.f32.mrf.mxu0 }
 0x952   :  { %v1737_v17 = vmax.f32 %v1734_v41, %v1699_v22  ;;  %v1908_v11 = vmax.f32 %v1905_v1, %v2699_v36 }
 0x953   :  { %v2669_v27 = vpop.f32.mrf.mxu1  ;;  %v1869_v31 = vpop.f32.mrf.mxu0 }
 0x954   :  { %v1740_v40 = vmax.f32 %v1737_v17, %v2669_v27  ;;  %v1907_v58 = vmax.f32 %v1904_v44, %v1869_v31 }
 0x955   :  { %v1709_v46 = vpop.f32.mrf.mxu1  ;;  %v2702_v56 = vpop.f32.mrf.mxu0 }
 0x956   :  { %v1913_v13 = vsub.f32 %v1740_v40, %v3545_v25  ;;  %v1739_v39 = vmax.f32 %v1736_v15, %v1709_v46  ;;  %v1910_v6 = vmax.f32 %v1907_v58, %v2702_v56 }
 0x957   :  { %v2672_v50 = vpop.f32.mrf.mxu1  ;;  %v1879_v52 = vpop.f32.mrf.mxu0 }
 0x958   :  { %v1742_v59 = vmax.f32 %v1739_v39, %v2672_v50  ;;  %1925 = vrot.lane.b32.xlu1 %v1913_v13, %s2744_s14  ;;  %v1909_v8 = vmax.f32 %v1906_v57, %v1879_v52  ;;  %v1916_v32 = vsub.f32 %v1910_v6, %v3555_v20 }
 0x959   :  { %v1719_v49 = vpop.f32.mrf.mxu1  ;;  %v2705_v62 = vpop.f32.mrf.mxu0 }
 0x95a   :  { %v1915_v4 = vsub.f32 %v1742_v59, %v3534_v37  ;;  %v1741_v29 = vmax.f32 %v1738_v35, %v1719_v49  ;;  %v1912_v42 = vmax.f32 %v1909_v8, %v2705_v62 }
 0x95b   :  { %v1889_v5 = vpop.f32.mrf.mxu0 }
 0x95c   :  { %v1914_v2 = vsub.f32 %v1741_v29, %v3537_v12  ;;  %v1911_v19 = vmax.f32 %v1908_v11, %v1889_v5  ;;  %1929 = vrot.lane.b32.xlu1 %v1915_v4, %s2744_s14  ;;  %v1918_v54 = vsub.f32 %v1912_v42, %v3540_v30 }
 0x95e   :  { %v1917_v21 = vsub.f32 %v1911_v19, %v3548_v16  ;;  %1927 = vrot.lane.b32.xlu0 %v1914_v2, %s2744_s14 }
 0x960   :  { %1933 = vrot.lane.b32.xlu1 %v1917_v21, %s2744_s14 }
 0x962   :  { %1931 = vrot.lane.b32.xlu0 %v1916_v32, %s2744_s14 }
 0x966   :  { %1935 = vrot.lane.b32.xlu0 %v1918_v54, %s2744_s14 }
 0x9ca   :  { %v1926_v9 = vpop.permute.xlu1 %1925 }
 0x9cb   :  { %v1943_v53 = vsel %vm114_vm0, %v3545_v25, %v1926_v9 }
 0x9cc   :  { %2722 = vmatprep.mubr.msk.f32.mxu1 %vm1436_vm14, %v1943_v53 }
 0x9ce   :  { %v1930_v33 = vpop.permute.xlu1 %1929 }
 0x9cf   :  { %v1945_v61 = vsel %vm114_vm0, %v3534_v37, %v1930_v33 }
 0x9d0   :  { %v1928_v48 = vpop.permute.xlu0 %1927 }
 0x9d1   :  { %v1944_v63 = vsel %vm114_vm0, %v3537_v12, %v1928_v48 }
 0x9d2   :  { %2723 = vmatmul.mubr.msk.f32.vlgmr.msra.gmra.mxu1 %vm1436_vm14, %v1944_v63  ;;  %v1934_v55 = vpop.permute.xlu1 %1933 }
 0x9d3   :  { %2725 = vmatprep.mubr.msk.f32.mxu1 %vm1436_vm14, %v1945_v61  ;;  %v1947_v43 = vsel %vm114_vm0, %v3548_v16, %v1934_v55 }
 0x9d4   :  { %v1932_v28 = vpop.permute.xlu0 %1931 }
 0x9d5   :  { %v1946_v10 = vsel %vm114_vm0, %v3555_v20, %v1932_v28 }
 0x9d6   :  { %2726 = vmatmul.mubr.msk.f32.gmra.mxu1 %vm1436_vm14, %v1946_v10 }
 0x9d7   :  { %2728 = vmatprep.mubr.msk.f32.mxu1 %vm1436_vm14, %v1947_v43 }
 0x9d8   :  { %v1936_v18 = vpop.permute.xlu0 %1935 }
 0x9d9   :  { %v1948_v51 = vsel %vm114_vm0, %v3540_v30, %v1936_v18  ;;  %vm2112_vm0 = vcmask 130048  }
 0x9da   :  { %2729 = vmatmul.mubr.msk.f32.gmra.mxu1 %vm1436_vm14, %v1948_v51 }
 0xa92   :  { %v2724_v0 = vpop.f32.mrf.mxu1 }
 0xa93   :  { %v2045_v14 = vadd.f32 %v2724_v0, %v2380_v23 }
 0xa94   :  { %v2039_v38 = vpop.f32.mrf.mxu1 }
 0xa95   :  { %v2040_v7 = vadd.f32 %v2380_v23, %v2039_v38  ;;  %v2069_v22 = vmax.f32 %v2045_v14, 0.0 }
 0xa96   :  { %v2727_v41 = vpop.f32.mrf.mxu1 }
 0xa97   :  { %v2068_v47 = vmax.f32 %v2040_v7, 0.0  ;;  %v2075_v27 = vadd.f32 %v2069_v22, %v3537_v12  ;;  %v2055_v15 = vadd.f32 %v2727_v41, %v2380_v23 }
 0xa98   :  { %v2049_v34 = vpop.f32.mrf.mxu1 }
 0xa99   :  { %v2074_v36 = vadd.f32 %v2068_v47, %v3545_v25  ;;  %v2050_v45 = vadd.f32 %v2380_v23, %v2049_v34  ;;  %v2071_v44 = vmax.f32 %v2055_v15, 0.0 }
 0xa9a   :  { %v2730_v26 = vpop.f32.mrf.mxu1 }
 0xa9b   :  { %v2070_v17 = vmax.f32 %v2050_v45, 0.0  ;;  %2080 = vxpose.xlu1.b32.start [1/2] (short) (narrow) %v2074_v36, 32  ;;  %v2065_v3 = vadd.f32 %v2730_v26, %v2380_v23  ;;  %v2077_v25 = vadd.f32 %v2071_v44, %v3555_v20 }
 0xa9c   :  { %v2059_v40 = vpop.f32.mrf.mxu1 }
 0xa9d   :  { %v2076_v31 = vadd.f32 %v2070_v17, %v3534_v37  ;;  %v2073_v24 = vmax.f32 %v2065_v3, 0.0  ;;  %v2060_v56 = vadd.f32 %v2380_v23, %v2059_v40 }
 0xa9f   :  { %2081 = vxpose.xlu1.b32.end [2/2] (short) (narrow) %v2075_v27, 32  ;;  %2117 = vxpose.xlu0.b32.start.end [1/1] (short) (narrow) %v2076_v31, 32  ;;  %v2079_v46 = vadd.f32 %v2073_v24, %v3540_v30  ;;  %v2072_v60 = vmax.f32 %v2060_v56, 0.0 }
 0xaa1   :  { %v2078_v1 = vadd.f32 %v2072_v60, %v3548_v16 }
 0xaa8   :  { %2191 = vxpose.xlu1.b32.start.end [1/1] (short) (narrow) %v2079_v46, 32 }
 0xaac   :  { %2154 = vxpose.xlu0.b32.start [1/2] (short) (narrow) %v2077_v25, 32 }
 0xab0   :  { %2155 = vxpose.xlu0.b32.end [2/2] (short) (narrow) %v2078_v1, 32 }
 0xb17   :  { %v2096_v37 = vpop.trf.xlu1 }
 0xb18   :  { %2113 = vst.msk [vmem:[%s3757_s4] sm:$0xff] %vm2112_vm0, %v2096_v37 }
 0xb1b   :  { %v2133_v12 = vpop.trf.xlu0  ;;  %v2097_v13 = vpop.trf.xlu1 }
 0xb1c   :  { %2150 = vst.msk [vmem:[%s3758_s5] sm:$0xff] %vm2149_vm8, %v2133_v12 }
 0xb1d   :  { %2114 = vst.msk [vmem:[%s3757_s4 + $0x8] sm:$0xff] %vm2112_vm0, %v2097_v13 }
 0xb1f   :  { %v2134_v30 = vpop.trf.xlu0  ;;  %v2098_v16 = vpop.trf.xlu1 }
 0xb20   :  { %2151 = vst.msk [vmem:[%s3758_s5 + $0x8] sm:$0xff] %vm2149_vm8, %v2134_v30 }
 0xb21   :  { %2115 = vst.msk [vmem:[%s3757_s4 + $0x10] sm:$0xff] %vm2112_vm0, %v2098_v16 }
 0xb23   :  { %v2135_v20 = vpop.trf.xlu0  ;;  %v2099_v39 = vpop.trf.xlu1 }
 0xb24   :  { %2152 = vst.msk [vmem:[%s3758_s5 + $0x10] sm:$0xff] %vm2149_vm8, %v2135_v20 }
 0xb25   :  { %2116 = vst.msk [vmem:[%s3757_s4 + $0x18] sm:$0xff] %vm2112_vm0, %v2099_v39 }
 0xb27   :  { %v2136_v50 = vpop.trf.xlu0  ;;  %v2207_v52 = vpop.trf.xlu1 }
 0xb28   :  { %2153 = vst.msk [vmem:[%s3758_s5 + $0x18] sm:$0xff] %vm2149_vm8, %v2136_v50  ;;  %2391 = vst.msk [vmem:[%s3758_s5 + $0x20] sm:$0xff] %vm2149_vm8, %v2207_v52 }
 0xb2b   :  { %v2170_v35 = vpop.trf.xlu0  ;;  %v2208_v58 = vpop.trf.xlu1 }
 0xb2c   :  { %2387 = vst.msk [vmem:[%s3757_s4 + $0x20] sm:$0xff] %vm2112_vm0, %v2170_v35 }
 0xb2d   :  { %2392 = vst.msk [vmem:[%s3758_s5 + $0x28] sm:$0xff] %vm2149_vm8, %v2208_v58 }
 0xb2f   :  { %v2171_v59 = vpop.trf.xlu0  ;;  %v2209_v49 = vpop.trf.xlu1 }
 0xb30   :  { %2388 = vst.msk [vmem:[%s3757_s4 + $0x28] sm:$0xff] %vm2112_vm0, %v2171_v59 }
 0xb31   :  { %2393 = vst.msk [vmem:[%s3758_s5 + $0x30] sm:$0xff] %vm2149_vm8, %v2209_v49 }
 0xb33   :  { %v2172_v62 = vpop.trf.xlu0  ;;  %v2210_v57 = vpop.trf.xlu1 }
 0xb34   :  { %2389 = vst.msk [vmem:[%s3757_s4 + $0x30] sm:$0xff] %vm2112_vm0, %v2172_v62 }
 0xb35   :  { %2394 = vst.msk [vmem:[%s3758_s5 + $0x38] sm:$0xff] %vm2149_vm8, %v2210_v57 }
 0xb37   :  { %v2173_v11 = vpop.trf.xlu0 }
 0xb38   :  { %2390 = vst.msk [vmem:[%s3757_s4 + $0x38] sm:$0xff] %vm2112_vm0, %v2173_v11 }

</bundles_post_ra>
